<compile_context>
chip_gen: v7x
topology: tpu7x:2x2x1
jax: 0.10.0
libtpu: 0.0.40
codegen_flags: <defaults>
</compile_context>

<pallas_src>
import functools

import jax
import jax.numpy as jnp
from jax.experimental import pallas as pl
from jax.experimental.pallas import tpu as pltpu


def autopad(k, p=None):
    if p is None:
        p = k // 2 if isinstance(k, int) else [x // 2 for x in k]
    return p


def _conv_bn_lrelu_kernel(x_ref, w_ref, scale_ref, bias_ref, o_ref, *,
                          k, h_out, w_out, negative_slope):
    """One (batch image, output-channel tile) grid step.

    x_ref:     (1, H_pad, W_pad, C1)     padded NHWC input slab
    w_ref:     (k*k, C1, TC2)            weight taps for this C2 tile
    scale_ref: (1, TC2)                  folded BN scale
    bias_ref:  (1, TC2)                  folded BN bias
    o_ref:     (1, H_out*W_out, TC2)     lane-dense output tile
    """
    c1 = x_ref.shape[-1]
    tc2 = o_ref.shape[-1]
    m = h_out * w_out

    acc = jnp.zeros((m, tc2), dtype=jnp.float32)
    # Statically unrolled loop over the k*k taps; each tap is one MXU matmul
    # (H_out*W_out, C1) @ (C1, TC2), accumulated in f32.
    for kh in range(k):
        for kw in range(k):
            patch = x_ref[0, kh:kh + h_out, kw:kw + w_out, :]   # (H_out, W_out, C1)
            lhs = patch.reshape(m, c1)
            acc = acc + jnp.dot(lhs, w_ref[kh * k + kw],
                                preferred_element_type=jnp.float32)

    y = acc * scale_ref[...] + bias_ref[...]          # fused BatchNorm (eval)
    y = jnp.where(y >= 0, y, y * negative_slope)      # LeakyReLU
    o_ref[0] = y.astype(o_ref.dtype)


def conv_bn_lrelu(x, w, gamma, beta, running_mean, running_var, *,
                  stride=1, padding=None, groups=1, eps=1e-5,
                  negative_slope=0.01, block_c2=128):
    """Pallas forward of `Conv`: Conv2d(bias=False) -> BatchNorm2d -> LeakyReLU.

    x: (N, C1, H, W) NCHW, w: (C2, C1, k, k) OIHW (PyTorch layouts).
    Returns (N, C2, H_out, W_out) NCHW.
    """
    if stride != 1 or groups != 1:
        # TODO(synk): stride > 1 / grouped conv not supported in this kernel.
        raise NotImplementedError("only stride=1, groups=1 supported")

    n, c1, h, w_sp = x.shape
    c2, c1_w, kh_, kw_ = w.shape
    assert c1_w == c1 and kh_ == kw_
    k = kh_
    p = autopad(k, padding)
    h_out = h + 2 * p - k + 1
    w_out = w_sp + 2 * p - k + 1
    h_pad, w_pad = h + 2 * p, w_sp + 2 * p

    # ---- wrapper-side layout plumbing (cheap XLA ops, no compute hoisted) ----
    x_nhwc = jnp.transpose(x, (0, 2, 3, 1))                       # channels -> lanes
    x_padded = jnp.pad(x_nhwc, ((0, 0), (p, p), (p, p), (0, 0)))
    w_taps = jnp.transpose(w, (2, 3, 1, 0)).reshape(k * k, c1, c2)  # (tap, C1, C2)

    # Fold eval-mode BatchNorm into a per-output-channel scale/bias.
    inv_std = jax.lax.rsqrt(running_var.astype(jnp.float32) + eps)
    g32 = gamma.astype(jnp.float32)
    scale = (g32 * inv_std).reshape(1, c2)
    bias = (beta.astype(jnp.float32)
            - running_mean.astype(jnp.float32) * g32 * inv_std).reshape(1, c2)

    # Output-channel tiling: 128-lane tiles when C2 is a multiple of 128
    # (keeps weight/output blocks lane-dense and VMEM bounded on v7x),
    # otherwise the full C2 (full-dim exception to the (8,128) rule).
    tc2 = block_c2 if (c2 % block_c2 == 0) else c2
    grid = (n, c2 // tc2)

    kernel = functools.partial(_conv_bn_lrelu_kernel, k=k, h_out=h_out,
                               w_out=w_out, negative_slope=negative_slope)

    out_flat = pl.pallas_call(
        kernel,
        out_shape=jax.ShapeDtypeStruct((n, h_out * w_out, c2), x.dtype),
        grid_spec=pltpu.PrefetchScalarGridSpec(
            num_scalar_prefetch=0,
            grid=grid,
            in_specs=[
                pl.BlockSpec((1, h_pad, w_pad, c1), lambda b, j: (b, 0, 0, 0)),
                pl.BlockSpec((k * k, c1, tc2), lambda b, j: (0, 0, j)),
                pl.BlockSpec((1, tc2), lambda b, j: (0, j)),
                pl.BlockSpec((1, tc2), lambda b, j: (0, j)),
            ],
            out_specs=pl.BlockSpec((1, h_out * w_out, tc2),
                                   lambda b, j: (b, 0, j)),
        ),
        compiler_params=pltpu.CompilerParams(
            dimension_semantics=("parallel", "parallel"),
        ),
    )(x_padded, w_taps, scale, bias)

    out_nhwc = out_flat.reshape(n, h_out, w_out, c2)
    return jnp.transpose(out_nhwc, (0, 3, 1, 2))   # back to NCHW


if __name__ == "__main__":
    key = jax.random.PRNGKey(0)
    kx, kw, kg, kb, km, kv = jax.random.split(key, 6)

    # Conv(c1=4, c2=32, k=3, s=1) -> autopad(3) = 1, output spatial unchanged.
    N, C1, H, W = 2, 4, 16, 16
    C2, K = 32, 3
    eps = 1e-5
    negative_slope = 0.01

    x = jax.random.normal(kx, (N, C1, H, W), dtype=jnp.float32)
    w = jax.random.normal(kw, (C2, C1, K, K), dtype=jnp.float32) / (C1 * K * K) ** 0.5
    gamma = jax.random.uniform(kg, (C2,), jnp.float32, 0.5, 1.5)
    beta = 0.1 * jax.random.normal(kb, (C2,), jnp.float32)
    running_mean = 0.1 * jax.random.normal(km, (C2,), jnp.float32)
    running_var = jax.random.uniform(kv, (C2,), jnp.float32, 0.5, 1.5)

    out = conv_bn_lrelu(x, w, gamma, beta, running_mean, running_var,
                        eps=eps, negative_slope=negative_slope)
    out = jax.block_until_ready(out)

    # Pure-JAX reference (same math as the PyTorch module in eval mode).
    p = autopad(K)
    ref = jax.lax.conv_general_dilated(
        x, w, window_strides=(1, 1), padding=((p, p), (p, p)),
        dimension_numbers=("NCHW", "OIHW", "NCHW"),
        precision=jax.lax.Precision.HIGHEST)
    inv_std = jax.lax.rsqrt(running_var + eps)
    ref = (ref * (gamma * inv_std)[None, :, None, None]
           + (beta - running_mean * gamma * inv_std)[None, :, None, None])
    ref = jnp.where(ref >= 0, ref, negative_slope * ref)

    assert out.shape == (N, C2, H, W)
    max_err = float(jnp.max(jnp.abs(out - ref)))
    assert jnp.allclose(out, ref, atol=2e-2, rtol=2e-2), max_err

    print("KERNEL_OK")
</pallas_src>

<mosaic_0001>
module attributes {stable_mosaic.version = 11 : i64} {
  func.func @_conv_bn_lrelu_kernel(%arg0: i32, %arg1: i32, %arg2: memref<1x18x18x4xf32, #tpu.memory_space<vmem>>, %arg3: memref<9x4x32xf32, #tpu.memory_space<vmem>>, %arg4: memref<1x32xf32, #tpu.memory_space<vmem>>, %arg5: memref<1x32xf32, #tpu.memory_space<vmem>>, %arg6: memref<1x256x32xf32, #tpu.memory_space<vmem>>) attributes {dimension_semantics = [#tpu.dimension_semantics<parallel>, #tpu.dimension_semantics<parallel>], iteration_bounds = array<i64: 2, 1>, scalar_prefetch = 0 : i64, scratch_operands = 0 : i64, tpu.core_type = #tpu.core_type<tc>, window_params = [{transform_indices = @transform_0, window_bounds = array<i64: 1, 18, 18, 4>}, {transform_indices = @transform_1, window_bounds = array<i64: 9, 4, 32>}, {transform_indices = @transform_2, window_bounds = array<i64: 1, 32>}, {transform_indices = @transform_3, window_bounds = array<i64: 1, 32>}, {transform_indices = @transform_4, window_bounds = array<i64: 1, 256, 32>}]} {
    %cst = arith.constant 0.000000e+00 : f32
    %0 = vector.broadcast %cst : f32 to vector<256x32xf32>
    %c0 = arith.constant 0 : index
    %c0_0 = arith.constant 0 : index
    %c0_1 = arith.constant 0 : index
    %c0_2 = arith.constant 0 : index
    %1 = vector.load %arg2[%c0, %c0_0, %c0_1, %c0_2] : memref<1x18x18x4xf32, #tpu.memory_space<vmem>>, vector<1x16x16x4xf32>
    %2 = vector.shape_cast %1 : vector<1x16x16x4xf32> to vector<16x16x4xf32>
    %3 = vector.shape_cast %2 : vector<16x16x4xf32> to vector<256x4xf32>
    %c0_3 = arith.constant 0 : index
    %c0_4 = arith.constant 0 : index
    %c0_5 = arith.constant 0 : index
    %4 = vector.load %arg3[%c0_3, %c0_4, %c0_5] : memref<9x4x32xf32, #tpu.memory_space<vmem>>, vector<1x4x32xf32>
    %5 = vector.shape_cast %4 : vector<1x4x32xf32> to vector<4x32xf32>
    %cst_6 = arith.constant dense<0.000000e+00> : vector<256x32xf32>
    %6 = tpu.matmul %3, %5, %cst_6 {dimension_numbers = #tpu.dot_dimension_numbers<[1], [0], [0], [1], [0, 0, 1, 1], [], []>} : vector<256x4xf32>, vector<4x32xf32>, vector<256x32xf32> -> vector<256x32xf32>
    %7 = arith.addf %0, %6 : vector<256x32xf32>
    %c0_7 = arith.constant 0 : index
    %c0_8 = arith.constant 0 : index
    %c1 = arith.constant 1 : index
    %c0_9 = arith.constant 0 : index
    %8 = vector.load %arg2[%c0_7, %c0_8, %c1, %c0_9] : memref<1x18x18x4xf32, #tpu.memory_space<vmem>>, vector<1x16x16x4xf32>
    %9 = vector.shape_cast %8 : vector<1x16x16x4xf32> to vector<16x16x4xf32>
    %10 = vector.shape_cast %9 : vector<16x16x4xf32> to vector<256x4xf32>
    %c1_10 = arith.constant 1 : index
    %c0_11 = arith.constant 0 : index
    %c0_12 = arith.constant 0 : index
    %11 = vector.load %arg3[%c1_10, %c0_11, %c0_12] : memref<9x4x32xf32, #tpu.memory_space<vmem>>, vector<1x4x32xf32>
    %12 = vector.shape_cast %11 : vector<1x4x32xf32> to vector<4x32xf32>
    %cst_13 = arith.constant dense<0.000000e+00> : vector<256x32xf32>
    %13 = tpu.matmul %10, %12, %cst_13 {dimension_numbers = #tpu.dot_dimension_numbers<[1], [0], [0], [1], [0, 0, 1, 1], [], []>} : vector<256x4xf32>, vector<4x32xf32>, vector<256x32xf32> -> vector<256x32xf32>
    %14 = arith.addf %7, %13 : vector<256x32xf32>
    %c0_14 = arith.constant 0 : index
    %c0_15 = arith.constant 0 : index
    %c2 = arith.constant 2 : index
    %c0_16 = arith.constant 0 : index
    %15 = vector.load %arg2[%c0_14, %c0_15, %c2, %c0_16] : memref<1x18x18x4xf32, #tpu.memory_space<vmem>>, vector<1x16x16x4xf32>
    %16 = vector.shape_cast %15 : vector<1x16x16x4xf32> to vector<16x16x4xf32>
    %17 = vector.shape_cast %16 : vector<16x16x4xf32> to vector<256x4xf32>
    %c2_17 = arith.constant 2 : index
    %c0_18 = arith.constant 0 : index
    %c0_19 = arith.constant 0 : index
    %18 = vector.load %arg3[%c2_17, %c0_18, %c0_19] : memref<9x4x32xf32, #tpu.memory_space<vmem>>, vector<1x4x32xf32>
    %19 = vector.shape_cast %18 : vector<1x4x32xf32> to vector<4x32xf32>
    %cst_20 = arith.constant dense<0.000000e+00> : vector<256x32xf32>
    %20 = tpu.matmul %17, %19, %cst_20 {dimension_numbers = #tpu.dot_dimension_numbers<[1], [0], [0], [1], [0, 0, 1, 1], [], []>} : vector<256x4xf32>, vector<4x32xf32>, vector<256x32xf32> -> vector<256x32xf32>
    %21 = arith.addf %14, %20 : vector<256x32xf32>
    %c0_21 = arith.constant 0 : index
    %c1_22 = arith.constant 1 : index
    %c0_23 = arith.constant 0 : index
    %c0_24 = arith.constant 0 : index
    %22 = vector.load %arg2[%c0_21, %c1_22, %c0_23, %c0_24] : memref<1x18x18x4xf32, #tpu.memory_space<vmem>>, vector<1x16x16x4xf32>
    %23 = vector.shape_cast %22 : vector<1x16x16x4xf32> to vector<16x16x4xf32>
    %24 = vector.shape_cast %23 : vector<16x16x4xf32> to vector<256x4xf32>
    %c3 = arith.constant 3 : index
    %c0_25 = arith.constant 0 : index
    %c0_26 = arith.constant 0 : index
    %25 = vector.load %arg3[%c3, %c0_25, %c0_26] : memref<9x4x32xf32, #tpu.memory_space<vmem>>, vector<1x4x32xf32>
    %26 = vector.shape_cast %25 : vector<1x4x32xf32> to vector<4x32xf32>
    %cst_27 = arith.constant dense<0.000000e+00> : vector<256x32xf32>
    %27 = tpu.matmul %24, %26, %cst_27 {dimension_numbers = #tpu.dot_dimension_numbers<[1], [0], [0], [1], [0, 0, 1, 1], [], []>} : vector<256x4xf32>, vector<4x32xf32>, vector<256x32xf32> -> vector<256x32xf32>
    %28 = arith.addf %21, %27 : vector<256x32xf32>
    %c0_28 = arith.constant 0 : index
    %c1_29 = arith.constant 1 : index
    %c1_30 = arith.constant 1 : index
    %c0_31 = arith.constant 0 : index
    %29 = vector.load %arg2[%c0_28, %c1_29, %c1_30, %c0_31] : memref<1x18x18x4xf32, #tpu.memory_space<vmem>>, vector<1x16x16x4xf32>
    %30 = vector.shape_cast %29 : vector<1x16x16x4xf32> to vector<16x16x4xf32>
    %31 = vector.shape_cast %30 : vector<16x16x4xf32> to vector<256x4xf32>
    %c4 = arith.constant 4 : index
    %c0_32 = arith.constant 0 : index
    %c0_33 = arith.constant 0 : index
    %32 = vector.load %arg3[%c4, %c0_32, %c0_33] : memref<9x4x32xf32, #tpu.memory_space<vmem>>, vector<1x4x32xf32>
    %33 = vector.shape_cast %32 : vector<1x4x32xf32> to vector<4x32xf32>
    %cst_34 = arith.constant dense<0.000000e+00> : vector<256x32xf32>
    %34 = tpu.matmul %31, %33, %cst_34 {dimension_numbers = #tpu.dot_dimension_numbers<[1], [0], [0], [1], [0, 0, 1, 1], [], []>} : vector<256x4xf32>, vector<4x32xf32>, vector<256x32xf32> -> vector<256x32xf32>
    %35 = arith.addf %28, %34 : vector<256x32xf32>
    %c0_35 = arith.constant 0 : index
    %c1_36 = arith.constant 1 : index
    %c2_37 = arith.constant 2 : index
    %c0_38 = arith.constant 0 : index
    %36 = vector.load %arg2[%c0_35, %c1_36, %c2_37, %c0_38] : memref<1x18x18x4xf32, #tpu.memory_space<vmem>>, vector<1x16x16x4xf32>
    %37 = vector.shape_cast %36 : vector<1x16x16x4xf32> to vector<16x16x4xf32>
    %38 = vector.shape_cast %37 : vector<16x16x4xf32> to vector<256x4xf32>
    %c5 = arith.constant 5 : index
    %c0_39 = arith.constant 0 : index
    %c0_40 = arith.constant 0 : index
    %39 = vector.load %arg3[%c5, %c0_39, %c0_40] : memref<9x4x32xf32, #tpu.memory_space<vmem>>, vector<1x4x32xf32>
    %40 = vector.shape_cast %39 : vector<1x4x32xf32> to vector<4x32xf32>
    %cst_41 = arith.constant dense<0.000000e+00> : vector<256x32xf32>
    %41 = tpu.matmul %38, %40, %cst_41 {dimension_numbers = #tpu.dot_dimension_numbers<[1], [0], [0], [1], [0, 0, 1, 1], [], []>} : vector<256x4xf32>, vector<4x32xf32>, vector<256x32xf32> -> vector<256x32xf32>
    %42 = arith.addf %35, %41 : vector<256x32xf32>
    %c0_42 = arith.constant 0 : index
    %c2_43 = arith.constant 2 : index
    %c0_44 = arith.constant 0 : index
    %c0_45 = arith.constant 0 : index
    %43 = vector.load %arg2[%c0_42, %c2_43, %c0_44, %c0_45] : memref<1x18x18x4xf32, #tpu.memory_space<vmem>>, vector<1x16x16x4xf32>
    %44 = vector.shape_cast %43 : vector<1x16x16x4xf32> to vector<16x16x4xf32>
    %45 = vector.shape_cast %44 : vector<16x16x4xf32> to vector<256x4xf32>
    %c6 = arith.constant 6 : index
    %c0_46 = arith.constant 0 : index
    %c0_47 = arith.constant 0 : index
    %46 = vector.load %arg3[%c6, %c0_46, %c0_47] : memref<9x4x32xf32, #tpu.memory_space<vmem>>, vector<1x4x32xf32>
    %47 = vector.shape_cast %46 : vector<1x4x32xf32> to vector<4x32xf32>
    %cst_48 = arith.constant dense<0.000000e+00> : vector<256x32xf32>
    %48 = tpu.matmul %45, %47, %cst_48 {dimension_numbers = #tpu.dot_dimension_numbers<[1], [0], [0], [1], [0, 0, 1, 1], [], []>} : vector<256x4xf32>, vector<4x32xf32>, vector<256x32xf32> -> vector<256x32xf32>
    %49 = arith.addf %42, %48 : vector<256x32xf32>
    %c0_49 = arith.constant 0 : index
    %c2_50 = arith.constant 2 : index
    %c1_51 = arith.constant 1 : index
    %c0_52 = arith.constant 0 : index
    %50 = vector.load %arg2[%c0_49, %c2_50, %c1_51, %c0_52] : memref<1x18x18x4xf32, #tpu.memory_space<vmem>>, vector<1x16x16x4xf32>
    %51 = vector.shape_cast %50 : vector<1x16x16x4xf32> to vector<16x16x4xf32>
    %52 = vector.shape_cast %51 : vector<16x16x4xf32> to vector<256x4xf32>
    %c7 = arith.constant 7 : index
    %c0_53 = arith.constant 0 : index
    %c0_54 = arith.constant 0 : index
    %53 = vector.load %arg3[%c7, %c0_53, %c0_54] : memref<9x4x32xf32, #tpu.memory_space<vmem>>, vector<1x4x32xf32>
    %54 = vector.shape_cast %53 : vector<1x4x32xf32> to vector<4x32xf32>
    %cst_55 = arith.constant dense<0.000000e+00> : vector<256x32xf32>
    %55 = tpu.matmul %52, %54, %cst_55 {dimension_numbers = #tpu.dot_dimension_numbers<[1], [0], [0], [1], [0, 0, 1, 1], [], []>} : vector<256x4xf32>, vector<4x32xf32>, vector<256x32xf32> -> vector<256x32xf32>
    %56 = arith.addf %49, %55 : vector<256x32xf32>
    %c0_56 = arith.constant 0 : index
    %c2_57 = arith.constant 2 : index
    %c2_58 = arith.constant 2 : index
    %c0_59 = arith.constant 0 : index
    %57 = vector.load %arg2[%c0_56, %c2_57, %c2_58, %c0_59] : memref<1x18x18x4xf32, #tpu.memory_space<vmem>>, vector<1x16x16x4xf32>
    %58 = vector.shape_cast %57 : vector<1x16x16x4xf32> to vector<16x16x4xf32>
    %59 = vector.shape_cast %58 : vector<16x16x4xf32> to vector<256x4xf32>
    %c8 = arith.constant 8 : index
    %c0_60 = arith.constant 0 : index
    %c0_61 = arith.constant 0 : index
    %60 = vector.load %arg3[%c8, %c0_60, %c0_61] : memref<9x4x32xf32, #tpu.memory_space<vmem>>, vector<1x4x32xf32>
    %61 = vector.shape_cast %60 : vector<1x4x32xf32> to vector<4x32xf32>
    %cst_62 = arith.constant dense<0.000000e+00> : vector<256x32xf32>
    %62 = tpu.matmul %59, %61, %cst_62 {dimension_numbers = #tpu.dot_dimension_numbers<[1], [0], [0], [1], [0, 0, 1, 1], [], []>} : vector<256x4xf32>, vector<4x32xf32>, vector<256x32xf32> -> vector<256x32xf32>
    %63 = arith.addf %56, %62 : vector<256x32xf32>
    %c0_63 = arith.constant 0 : index
    %c0_64 = arith.constant 0 : index
    %64 = vector.load %arg4[%c0_63, %c0_64] : memref<1x32xf32, #tpu.memory_space<vmem>>, vector<1x32xf32>
    %65 = vector.broadcast %64 : vector<1x32xf32> to vector<256x32xf32>
    %66 = arith.mulf %63, %65 : vector<256x32xf32>
    %c0_65 = arith.constant 0 : index
    %c0_66 = arith.constant 0 : index
    %67 = vector.load %arg5[%c0_65, %c0_66] : memref<1x32xf32, #tpu.memory_space<vmem>>, vector<1x32xf32>
    %68 = vector.broadcast %67 : vector<1x32xf32> to vector<256x32xf32>
    %69 = arith.addf %66, %68 : vector<256x32xf32>
    %cst_67 = arith.constant 0.000000e+00 : f32
    %70 = vector.broadcast %cst_67 : f32 to vector<256x32xf32>
    %71 = arith.cmpf oge, %69, %70 : vector<256x32xf32>
    %cst_68 = arith.constant 0.00999999977 : f32
    %72 = vector.broadcast %cst_68 : f32 to vector<256x32xf32>
    %73 = arith.mulf %69, %72 : vector<256x32xf32>
    %74 = arith.select %71, %69, %73 : vector<256x32xi1>, vector<256x32xf32>
    %c0_69 = arith.constant 0 : index
    %c0_70 = arith.constant 0 : index
    %c0_71 = arith.constant 0 : index
    %75 = vector.load %arg6[%c0_69, %c0_70, %c0_71] : memref<1x256x32xf32, #tpu.memory_space<vmem>>, vector<1x256x32xf32>
    %76 = vector.shape_cast %75 : vector<1x256x32xf32> to vector<256x32xf32>
    %77 = vector.shape_cast %74 : vector<256x32xf32> to vector<1x256x32xf32>
    tpu.vector_store %arg6[%c0_69, %c0_70, %c0_71], %77 {strides = array<i32>} : memref<1x256x32xf32, #tpu.memory_space<vmem>>, vector<1x256x32xf32>,
    return
  }
  func.func @transform_0(%arg0: i32, %arg1: i32) -> (i32, i32, i32, i32) {
    %c0_i32 = arith.constant 0 : i32
    %c0_i32_0 = arith.constant 0 : i32
    %c0_i32_1 = arith.constant 0 : i32
    %c0_i32_2 = arith.constant 0 : i32
    return %arg0, %c0_i32, %c0_i32_0, %c0_i32_1 : i32, i32, i32, i32
  }
  func.func @transform_1(%arg0: i32, %arg1: i32) -> (i32, i32, i32) {
    %c0_i32 = arith.constant 0 : i32
    %c0_i32_0 = arith.constant 0 : i32
    %c0_i32_1 = arith.constant 0 : i32
    return %c0_i32, %c0_i32_0, %arg1 : i32, i32, i32
  }
  func.func @transform_2(%arg0: i32, %arg1: i32) -> (i32, i32) {
    %c0_i32 = arith.constant 0 : i32
    %c0_i32_0 = arith.constant 0 : i32
    return %c0_i32, %arg1 : i32, i32
  }
  func.func @transform_3(%arg0: i32, %arg1: i32) -> (i32, i32) {
    %c0_i32 = arith.constant 0 : i32
    %c0_i32_0 = arith.constant 0 : i32
    return %c0_i32, %arg1 : i32, i32
  }
  func.func @transform_4(%arg0: i32, %arg1: i32) -> (i32, i32, i32) {
    %c0_i32 = arith.constant 0 : i32
    %c0_i32_0 = arith.constant 0 : i32
    return %arg0, %c0_i32, %arg1 : i32, i32, i32
  }
}

</mosaic_0001>

<bundles_post_ra>
// kernel: tpu_custom_call.1
= control target key start
LH: loop header
LB: loop body
LE: loop exit
PB: predicated region body
PF: predicated region fallthrough
CT: control target
= control target key end

     0   :  { %s5628_s15 = smov 0   ;;  %s5630_s16 = smov 0   ;;  %s6756_s0 = inlined_call_operand.vmem [shape: f32[2,18,18,4], index: 0, kind: input, shape index: {}]   ;;  %s6757_s1 = inlined_call_operand.vmem [shape: f32[9,4,32], index: 1, kind: input, shape index: {}]   ;;  %s6758_s2 = inlined_call_operand.vmem [shape: f32[1,32], index: 2, kind: input, shape index: {}]   ;;  %s6759_s3 = inlined_call_operand.vmem [shape: f32[1,32], index: 3, kind: input, shape index: {}]   ;;  %s6760_s4 = inlined_call_operand.vmem [shape: f32[2,256,32], index: 4, kind: output, shape index: {}]  }
   0x1   :  { %s5632_s17 = smov 0  }
   0x2 LB: > { %s26_s18 = sadd.s32 1, %s5597_s16  ;;  %p4043_p0 = scmp.ge.s32.totalorder %s5601_s17, 1  ;;  %s5601_s17 = sphi %s5632_s17, %s14_s17   ;;  %s5597_s16 = sphi %s5630_s16, %s6871_s16   ;;  %s5593_s15 = sphi %s5628_s15, %s6870_s15  }
   0x3   : > { %p28_p1 = scmp.ge.s32.totalorder %s26_s18, 2  ;;  %p201_p2 = scmp.lt.s32.totalorder %s5601_s17, 3 }
   0x5   : > { %s6873_s18 = smov (%p28_p1, %s26_s18), 0  ;;  %p202_p3 = pnand %p4043_p0, %p201_p2 }
   0x7   : > { %205 = sbr.rel (%p202_p3) target bundleno = 529 (0x211), region = 36 }
   0xe   : > { %v4047_v0 = vld [vmem:[%s6757_s1 + $0x4] sm:$0xf]  ;;  %vm427_vm0 = vcmask 1043456   ;;  %v5652_v1 = vld [vmem:[%s6757_s1 + $0x10] sm:$0xf]  ;;  %p240_p4 = scmp.lt.s32.totalorder %s5593_s15, 1 }
   0xf   : > { %4846 = vmatprep.subr.msk.mxu1 %vm427_vm0, %v4047_v0  ;;  %5046 = vmatprep.subr.msk.mxu0 %vm427_vm0, %v5652_v1  ;;  %v295_v2 = vld [vmem:[%s6757_s1] sm:$0xf]  ;;  %v4312_v3 = vld [vmem:[%s6757_s1 + $0x14] sm:$0xf]  ;;  %vm330_vm1 = vcmask 31744   ;;  %vm3886_vm3 = vcmask 261120  }
  0x10   : > { %4847 = vmatpush3.msk.msra.mxu1 %vm427_vm0, %v4047_v0  ;;  %5047 = vmatpush3.msk.msra.mxu0 %vm427_vm0, %v5652_v1  ;;  %s6875_s15 = smov (!%p240_p4, %s5593_s15), 1  ;;  %v4378_v9 = vld [vmem:[%s6757_s1 + $0x18] sm:$0xf]  ;;  %v5693_v10 = vld [vmem:[%s6757_s1 + $0x8] sm:$0xf] }
  0x11   : > { %4896 = vmatprep.subr.msk.mxu1 %vm427_vm0, %v295_v2  ;;  %5096 = vmatprep.subr.msk.mxu0 %vm427_vm0, %v4312_v3  ;;  %s5554_s27 = smul.u32 432, %s6875_s15  ;;  %v5812_v28 = vld [vmem:[%s6757_s1 + $0x1c] sm:$0xf]  ;;  %v5975_v61 = vld [vmem:[%s6757_s1 + $0xc] sm:$0xf]  ;;  %s4548_s23 = sshll.u32 %s6875_s15, 8 }
  0x12   : > { %s6613_s26 = scalar_lea.vmem %s6760_s4, %s4548_s23 }
  0x13   : > { %s5674_s30 = scalar_lea.vmem %s6756_s0, %s5554_s27 }
  0x14   : > { %v296_v4 = vld [vmem:[%s5674_s30 + $0x1] sm:$0xff]  ;;  %v4214_v5 = vld [vmem:[%s5674_s30 + $0x19] sm:$0xff]  ;;  %v297_v6 = vld [vmem:[%s5674_s30 + $0x9] sm:$0xff] }
  0x15   : > { %4848 = vmatprep.mubr.msk.f32.mxu1 %vm330_vm1, %v296_v4  ;;  %5048 = vmatprep.mubr.msk.f32.mxu0 %vm330_vm1, %v4214_v5  ;;  %v4215_v7 = vld [vmem:[%s5674_s30 + $0x21] sm:$0xff]  ;;  %v5683_v8 = vld [vmem:[%s5674_s30 + $0x31] sm:$0xff]  ;;  %v5698_v11 = vld [vmem:[%s5674_s30 + $0x39] sm:$0xff] }
  0x16   : > { %4849 = vmatmul.mubr.msk.f32.vlgmr.msra.gmra.mrb[0].mxu1 %vm330_vm1, %v297_v6  ;;  %5049 = vmatmul.mubr.msk.f32.vlgmr.msra.gmra.mrb[0].mxu0 %vm330_vm1, %v4215_v7  ;;  %v5704_v12 = vld [vmem:[%s5674_s30 + $0x49] sm:$0xff]  ;;  %v5717_v13 = vld [vmem:[%s5674_s30 + $0x51] sm:$0xff]  ;;  %v5720_v14 = vld [vmem:[%s5674_s30 + $0x61] sm:$0xff] }
  0x17   : > { %4897 = vmatpush3.msk.msra.mxu1 %vm427_vm0, %v295_v2  ;;  %5097 = vmatpush3.msk.msra.mxu0 %vm427_vm0, %v4312_v3  ;;  %v5731_v15 = vld [vmem:[%s5674_s30 + $0x69] sm:$0xff]  ;;  %v5734_v16 = vld [vmem:[%s5674_s30 + $0x79] sm:$0xff]  ;;  %v5745_v17 = vld [vmem:[%s5674_s30 + $0x81] sm:$0xff] }
  0x18   : > { %4851 = vmatprep.mubr.msk.f32.mxu1 %vm330_vm1, %v4214_v5  ;;  %5051 = vmatprep.mubr.msk.f32.mxu0 %vm330_vm1, %v5683_v8  ;;  %v5748_v18 = vld [vmem:[%s5674_s30 + $0x91] sm:$0xff]  ;;  %v5759_v19 = vld [vmem:[%s5674_s30 + $0x99] sm:$0xff]  ;;  %v5762_v20 = vld [vmem:[%s5674_s30 + $0xa9] sm:$0xff] }
  0x19   : > { %5146 = vmatprep.subr.msk.mxu0 %vm427_vm0, %v4378_v9  ;;  %4946 = vmatprep.subr.msk.mxu1 %vm427_vm0, %v5693_v10  ;;  %v5773_v21 = vld [vmem:[%s5674_s30 + $0xb1] sm:$0xff]  ;;  %v5776_v22 = vld [vmem:[%s5674_s30 + $0xc1] sm:$0xff]  ;;  %v5787_v23 = vld [vmem:[%s5674_s30 + $0xc9] sm:$0xff] }
  0x1a   : > { %4852 = vmatmul.mubr.msk.f32.gmra.mrb[2].mxu1 %vm330_vm1, %v4215_v7  ;;  %5052 = vmatmul.mubr.msk.f32.gmra.mrb[2].mxu0 %vm330_vm1, %v5698_v11  ;;  %v5790_v24 = vld [vmem:[%s5674_s30 + $0x1a] sm:$0xff]  ;;  %v5801_v25 = vld [vmem:[%s5674_s30 + $0x22] sm:$0xff]  ;;  %v5807_v27 = vld [vmem:[%s5674_s30 + $0x32] sm:$0xff] }
  0x1b   : > { %4854 = vmatprep.mubr.msk.f32.mxu1 %vm330_vm1, %v5683_v8  ;;  %5054 = vmatprep.mubr.msk.f32.mxu0 %vm330_vm1, %v5704_v12  ;;  %v5804_v26 = vld [vmem:[%s5674_s30 + $0xd9] sm:$0xff]  ;;  %v5822_v29 = vld [vmem:[%s5674_s30 + $0xe1] sm:$0xff]  ;;  %v5830_v31 = vld [vmem:[%s5674_s30 + $0xf1] sm:$0xff] }
  0x1c   : > { %6806 = vst [vmem:[#allocation2_spill] sm:$0xff] %v5822_v29  ;;  %v5825_v30 = vld [vmem:[%s5674_s30 + $0x3a] sm:$0xff]  ;;  %6807 = vst [vmem:[#allocation3_spill] sm:$0xff] %v5830_v31  ;;  %v5833_v32 = vld [vmem:[%s5674_s30 + $0x4a] sm:$0xff] }
  0x1d   : > { %v5846_v33 = vld [vmem:[%s5674_s30 + $0xf9] sm:$0xff]  ;;  %v5852_v35 = vld [vmem:[%s5674_s30 + $0x109] sm:$0xff]  ;;  %v5866_v37 = vld [vmem:[%s5674_s30 + $0x111] sm:$0xff] }
  0x1e   : > { %4855 = vmatmul.mubr.msk.f32.gmra.mrb[4].mxu1 %vm330_vm1, %v5698_v11  ;;  %5055 = vmatmul.mubr.msk.f32.gmra.mrb[4].mxu0 %vm330_vm1, %v5717_v13  ;;  %6808 = vst [vmem:[#allocation4_spill] sm:$0xff] %v5846_v33  ;;  %v5849_v34 = vld [vmem:[%s5674_s30 + $0x52] sm:$0xff]  ;;  %6809 = vst [vmem:[#allocation5_spill] sm:$0xff] %v5852_v35  ;;  %v5855_v36 = vld [vmem:[%s5674_s30 + $0x62] sm:$0xff] }
  0x1f   : > { %4857 = vmatprep.mubr.msk.f32.mxu1 %vm330_vm1, %v5704_v12  ;;  %5057 = vmatprep.mubr.msk.f32.mxu0 %vm330_vm1, %v5720_v14  ;;  %6810 = vst [vmem:[#allocation6_spill] sm:$0xff] %v5866_v37  ;;  %v5869_v38 = vld [vmem:[%s5674_s30 + $0x6a] sm:$0xff]  ;;  %v5872_v39 = vld [vmem:[%s5674_s30 + $0x121] sm:$0xff]  ;;  %v5892_v43 = vld [vmem:[%s5674_s30 + $0x139] sm:$0xff] }
  0x20   : > { %6811 = vst [vmem:[#allocation7_spill] sm:$0xff] %v5872_v39  ;;  %v5875_v40 = vld [vmem:[%s5674_s30 + $0x7a] sm:$0xff]  ;;  %v5886_v41 = vld [vmem:[%s5674_s30 + $0x129] sm:$0xff]  ;;  %6813 = vst [vmem:[#allocation9_spill] sm:$0xff] %v5892_v43 }
  0x21   : > { %6812 = vst [vmem:[#allocation8_spill] sm:$0xff] %v5886_v41  ;;  %v5889_v42 = vld [vmem:[%s5674_s30 + $0x82] sm:$0xff]  ;;  %v5895_v44 = vld [vmem:[%s5674_s30 + $0x92] sm:$0xff]  ;;  %v5909_v46 = vld [vmem:[%s5674_s30 + $0x9a] sm:$0xff] }
  0x22   : > { %4858 = vmatmul.mubr.msk.f32.gmra.mrb[6].mxu1 %vm330_vm1, %v5717_v13  ;;  %5058 = vmatmul.mubr.msk.f32.gmra.mrb[6].mxu0 %vm330_vm1, %v5731_v15  ;;  %v5906_v45 = vld [vmem:[%s5674_s30 + $0x141] sm:$0xff]  ;;  %v5912_v47 = vld [vmem:[%s5674_s30 + $0x151] sm:$0xff]  ;;  %v5926_v49 = vld [vmem:[%s5674_s30 + $0x159] sm:$0xff] }
  0x23   : > { %4860 = vmatprep.mubr.msk.f32.mxu1 %vm330_vm1, %v5720_v14  ;;  %5060 = vmatprep.mubr.msk.f32.mxu0 %vm330_vm1, %v5734_v16  ;;  %6814 = vst [vmem:[#allocation10_spill] sm:$0xff] %v5906_v45  ;;  %6815 = vst [vmem:[#allocation11_spill] sm:$0xff] %v5912_v47  ;;  %v5915_v48 = vld [vmem:[%s5674_s30 + $0xaa] sm:$0xff]  ;;  %v5929_v50 = vld [vmem:[%s5674_s30 + $0xb2] sm:$0xff] }
  0x24   : > { %6816 = vst [vmem:[#allocation12_spill] sm:$0xff] %v5926_v49  ;;  %v5932_v51 = vld [vmem:[%s5674_s30 + $0x169] sm:$0xff]  ;;  %v5946_v53 = vld [vmem:[%s5674_s30 + $0x171] sm:$0xff]  ;;  %v263_v55 = vld [vmem:[%s5674_s30] sm:$0xff] }
  0x25   : > { %6817 = vst [vmem:[#allocation13_spill] sm:$0xff] %v5932_v51  ;;  %v5935_v52 = vld [vmem:[%s5674_s30 + $0xc2] sm:$0xff]  ;;  %6818 = vst [vmem:[#allocation14_spill] sm:$0xff] %v5946_v53  ;;  %v5949_v54 = vld [vmem:[%s5674_s30 + $0xca] sm:$0xff] }
  0x26   : > { %4861 = vmatmul.mubr.msk.f32.gmra.mrb[8].mxu1 %vm330_vm1, %v5731_v15  ;;  %5061 = vmatmul.mubr.msk.f32.gmra.mrb[8].mxu0 %vm330_vm1, %v5745_v17  ;;  %v5953_v56 = vld [vmem:[%s5674_s30 + $0xda] sm:$0xff]  ;;  %v264_v57 = vld [vmem:[%s5674_s30 + $0x8] sm:$0xff]  ;;  %v5970_v60 = vld [vmem:[%s5674_s30 + $0xf2] sm:$0xff] }
  0x27   : > { %4863 = vmatprep.mubr.msk.f32.mxu1 %vm330_vm1, %v5734_v16  ;;  %5063 = vmatprep.mubr.msk.f32.mxu0 %vm330_vm1, %v5748_v18  ;;  %v5964_v58 = vld [vmem:[%s5674_s30 + $0xe2] sm:$0xff]  ;;  %v5967_v59 = vld [vmem:[%s5674_s30 + $0x18] sm:$0xff]  ;;  %v5993_v0 = vld [vmem:[%s5674_s30 + $0x30] sm:$0xff] }
  0x28   : > { %6819 = vst [vmem:[#allocation15_spill] sm:$0xff] %v5967_v59  ;;  %v5985_v62 = vld [vmem:[%s5674_s30 + $0x20] sm:$0xff]  ;;  %6821 = vst [vmem:[#allocation17_spill] sm:$0xff] %v5993_v0  ;;  %v5996_v2 = vld [vmem:[%s5674_s30 + $0x10a] sm:$0xff] }
  0x29   : > { %6820 = vst [vmem:[#allocation16_spill] sm:$0xff] %v5985_v62  ;;  %v5988_v63 = vld [vmem:[%s5674_s30 + $0xfa] sm:$0xff]  ;;  %v6012_v4 = vld [vmem:[%s5674_s30 + $0x112] sm:$0xff]  ;;  %v6015_v5 = vld [vmem:[%s5674_s30 + $0x48] sm:$0xff] }
  0x2a   : > { %4864 = vmatmul.mubr.msk.f32.gmra.mrb[10].mxu1 %vm330_vm1, %v5745_v17  ;;  %5064 = vmatmul.mubr.msk.f32.gmra.mrb[10].mxu0 %vm330_vm1, %v5759_v19  ;;  %v6009_v3 = vld [vmem:[%s5674_s30 + $0x38] sm:$0xff]  ;;  %6823 = vst [vmem:[#allocation19_spill] sm:$0xff] %v6015_v5  ;;  %v6018_v6 = vld [vmem:[%s5674_s30 + $0x122] sm:$0xff]  ;;  %v6029_v7 = vld [vmem:[%s5674_s30 + $0x50] sm:$0xff] }
  0x2b   : > { %4866 = vmatprep.mubr.msk.f32.mxu1 %vm330_vm1, %v5748_v18  ;;  %5066 = vmatprep.mubr.msk.f32.mxu0 %vm330_vm1, %v5762_v20  ;;  %6822 = vst [vmem:[#allocation18_spill] sm:$0xff] %v6009_v3  ;;  %6824 = vst [vmem:[#allocation20_spill] sm:$0xff] %v6029_v7 }
  0x2e   : > { %4867 = vmatmul.mubr.msk.f32.gmra.mrb[12].mxu1 %vm330_vm1, %v5759_v19  ;;  %5067 = vmatmul.mubr.msk.f32.gmra.mrb[12].mxu0 %vm330_vm1, %v5773_v21 }
  0x2f   : > { %4869 = vmatprep.mubr.msk.f32.mxu1 %vm330_vm1, %v5762_v20  ;;  %5069 = vmatprep.mubr.msk.f32.mxu0 %vm330_vm1, %v5776_v22 }
  0x32   : > { %4870 = vmatmul.mubr.msk.f32.gmra.mrb[14].mxu1 %vm330_vm1, %v5773_v21  ;;  %5070 = vmatmul.mubr.msk.f32.gmra.mrb[14].mxu0 %vm330_vm1, %v5787_v23 }
  0x33   : > { %4872 = vmatprep.mubr.msk.f32.mxu1 %vm330_vm1, %v5776_v22  ;;  %5098 = vmatprep.mubr.msk.f32.mxu0 %vm330_vm1, %v5790_v24 }
  0x36   : > { %4873 = vmatmul.mubr.msk.f32.gmra.mrb[16].mxu1 %vm330_vm1, %v5787_v23  ;;  %5099 = vmatmul.mubr.msk.f32.vlgmr.msra.gmra.mrb[0].mxu0 %vm330_vm1, %v5801_v25 }
  0x37   : > { %5147 = vmatpush3.msk.msra.mxu0 %vm427_vm0, %v4378_v9  ;;  %4875 = vmatprep.mubr.msk.f32.mxu1 %vm330_vm1, %v5804_v26  ;;  %v6032_v9 = vld [vmem:[%s5674_s30 + $0x12a] sm:$0xff] }
  0x38   : > { %5101 = vmatprep.mubr.msk.f32.mxu0 %vm330_vm1, %v5807_v27  ;;  %5196 = vmatprep.subr.msk.mxu0 %vm427_vm0, %v5812_v28 }
  0x3a   : > { %4876 = vmatmul.mubr.msk.f32.gmra.mrb[18].mxu1 %vm330_vm1, %v5822_v29  ;;  %5102 = vmatmul.mubr.msk.f32.gmra.mrb[2].mxu0 %vm330_vm1, %v5825_v30  ;;  %v6129_v29 = vld [vmem:[%s5674_s30 + $0xd8] sm:$0xff] }
  0x3b   : > { %4878 = vmatprep.mubr.msk.f32.mxu1 %vm330_vm1, %v5830_v31  ;;  %5104 = vmatprep.mubr.msk.f32.mxu0 %vm330_vm1, %v5833_v32  ;;  %v6112_v31 = vld [vmem:[%s5674_s30 + $0x18a] sm:$0xff] }
  0x3c   : > { %6835 = vst [vmem:[#allocation31_spill] sm:$0xff] %v6112_v31 }
  0x3e   : > { %4879 = vmatmul.mubr.msk.f32.gmra.mrb[20].mxu1 %vm330_vm1, %v5846_v33  ;;  %5105 = vmatmul.mubr.msk.f32.gmra.mrb[4].mxu0 %vm330_vm1, %v5849_v34  ;;  %v6098_v33 = vld [vmem:[%s5674_s30 + $0x182] sm:$0xff] }
  0x3f   : > { %4881 = vmatprep.mubr.msk.f32.mxu1 %vm330_vm1, %v5852_v35  ;;  %5107 = vmatprep.mubr.msk.f32.mxu0 %vm330_vm1, %v5855_v36  ;;  %v6095_v35 = vld [vmem:[%s5674_s30 + $0xa8] sm:$0xff]  ;;  %6833 = vst [vmem:[#allocation29_spill] sm:$0xff] %v6098_v33 }
  0x40   : > { %6832 = vst [vmem:[#allocation28_spill] sm:$0xff] %v6095_v35 }
  0x42   : > { %4882 = vmatmul.mubr.msk.f32.gmra.mrb[22].mxu1 %vm330_vm1, %v5866_v37  ;;  %5108 = vmatmul.mubr.msk.f32.gmra.mrb[6].mxu0 %vm330_vm1, %v5869_v38  ;;  %v6092_v37 = vld [vmem:[%s5674_s30 + $0x172] sm:$0xff] }
  0x43   : > { %4884 = vmatprep.mubr.msk.f32.mxu1 %vm330_vm1, %v5872_v39  ;;  %5110 = vmatprep.mubr.msk.f32.mxu0 %vm330_vm1, %v5875_v40  ;;  %v6089_v39 = vld [vmem:[%s5674_s30 + $0x98] sm:$0xff]  ;;  %6831 = vst [vmem:[#allocation27_spill] sm:$0xff] %v6092_v37 }
  0x44   : > { %6830 = vst [vmem:[#allocation26_spill] sm:$0xff] %v6089_v39 }
  0x46   : > { %4885 = vmatmul.mubr.msk.f32.gmra.mrb[24].mxu1 %vm330_vm1, %v5886_v41  ;;  %5111 = vmatmul.mubr.msk.f32.gmra.mrb[8].mxu0 %vm330_vm1, %v5889_v42  ;;  %v6078_v41 = vld [vmem:[%s5674_s30 + $0x16a] sm:$0xff] }
  0x47   : > { %4887 = vmatprep.mubr.msk.f32.mxu1 %vm330_vm1, %v5892_v43  ;;  %5113 = vmatprep.mubr.msk.f32.mxu0 %vm330_vm1, %v5895_v44  ;;  %v6075_v43 = vld [vmem:[%s5674_s30 + $0x90] sm:$0xff] }
  0x48   : > { %6829 = vst [vmem:[#allocation25_spill] sm:$0xff] %v6075_v43 }
  0x4a   : > { %4888 = vmatmul.mubr.msk.f32.gmra.mrb[26].mxu1 %vm330_vm1, %v5906_v45  ;;  %5114 = vmatmul.mubr.msk.f32.gmra.mrb[10].mxu0 %vm330_vm1, %v5909_v46  ;;  %v6072_v45 = vld [vmem:[%s5674_s30 + $0x15a] sm:$0xff] }
  0x4b   : > { %4890 = vmatprep.mubr.msk.f32.mxu1 %vm330_vm1, %v5912_v47  ;;  %5116 = vmatprep.mubr.msk.f32.mxu0 %vm330_vm1, %v5915_v48  ;;  %v6069_v47 = vld [vmem:[%s5674_s30 + $0x80] sm:$0xff] }
  0x4c   : > { %6828 = vst [vmem:[#allocation24_spill] sm:$0xff] %v6069_v47 }
  0x4e   : > { %4891 = vmatmul.mubr.msk.f32.gmra.mrb[28].mxu1 %vm330_vm1, %v5926_v49  ;;  %5117 = vmatmul.mubr.msk.f32.gmra.mrb[12].mxu0 %vm330_vm1, %v5929_v50  ;;  %v6058_v49 = vld [vmem:[%s5674_s30 + $0x152] sm:$0xff] }
  0x4f   : > { %4893 = vmatprep.mubr.msk.f32.mxu1 %vm330_vm1, %v5932_v51  ;;  %5119 = vmatprep.mubr.msk.f32.mxu0 %vm330_vm1, %v5935_v52  ;;  %v6055_v51 = vld [vmem:[%s5674_s30 + $0x78] sm:$0xff] }
  0x50   : > { %6827 = vst [vmem:[#allocation23_spill] sm:$0xff] %v6055_v51 }
  0x52   : > { %4894 = vmatmul.mubr.msk.f32.gmra.mrb[30].mxu1 %vm330_vm1, %v5946_v53  ;;  %5120 = vmatmul.mubr.msk.f32.gmra.mrb[14].mxu0 %vm330_vm1, %v5949_v54  ;;  %v6052_v53 = vld [vmem:[%s5674_s30 + $0x142] sm:$0xff] }
  0x53   : > { %4898 = vmatprep.mubr.msk.f32.mxu1 %vm330_vm1, %v263_v55  ;;  %5122 = vmatprep.mubr.msk.f32.mxu0 %vm330_vm1, %v5953_v56  ;;  %v6038_v55 = vld [vmem:[%s5674_s30 + $0x13a] sm:$0xff] }
  0x56   : > { %4899 = vmatmul.mubr.msk.f32.vlgmr.msra.gmra.mrb[0].mxu1 %vm330_vm1, %v264_v57  ;;  %5123 = vmatmul.mubr.msk.f32.gmra.mrb[16].mxu0 %vm330_vm1, %v5964_v58  ;;  %v6049_v57 = vld [vmem:[%s5674_s30 + $0x68] sm:$0xff] }
  0x57   : > { %4947 = vmatpush3.msk.msra.mxu1 %vm427_vm0, %v5693_v10  ;;  %4901 = vmatprep.mubr.msk.f32.mxu1 %vm330_vm1, %v5967_v59  ;;  %v6035_v10 = vld [vmem:[%s5674_s30 + $0x60] sm:$0xff]  ;;  %6826 = vst [vmem:[#allocation22_spill] sm:$0xff] %v6049_v57 }
  0x58   : > { %5125 = vmatprep.mubr.msk.f32.mxu0 %vm330_vm1, %v5970_v60  ;;  %4996 = vmatprep.subr.msk.mxu1 %vm427_vm0, %v5975_v61  ;;  %6825 = vst [vmem:[#allocation21_spill] sm:$0xff] %v6035_v10  ;;  %v6115_v59 = vld [vmem:[%s5674_s30 + $0xc0] sm:$0xff] }
  0x5a   : > { %4902 = vmatmul.mubr.msk.f32.gmra.mrb[2].mxu1 %vm330_vm1, %v5985_v62  ;;  %5126 = vmatmul.mubr.msk.f32.gmra.mrb[18].mxu0 %vm330_vm1, %v5988_v63  ;;  %v6109_v62 = vld [vmem:[%s5674_s30 + $0xb0] sm:$0xff] }
  0x5b   : > { %4904 = vmatprep.mubr.msk.f32.mxu1 %vm330_vm1, %v5993_v0  ;;  %5128 = vmatprep.mubr.msk.f32.mxu0 %vm330_vm1, %v5996_v2  ;;  %6834 = vst [vmem:[#allocation30_spill] sm:$0xff] %v6109_v62 }
  0x5e   : > { %4905 = vmatmul.mubr.msk.f32.gmra.mrb[4].mxu1 %vm330_vm1, %v6009_v3  ;;  %5129 = vmatmul.mubr.msk.f32.gmra.mrb[20].mxu0 %vm330_vm1, %v6012_v4 }
  0x5f   : > { %4907 = vmatprep.mubr.msk.f32.mxu1 %vm330_vm1, %v6015_v5  ;;  %5131 = vmatprep.mubr.msk.f32.mxu0 %vm330_vm1, %v6018_v6 }
  0x62   : > { %4908 = vmatmul.mubr.msk.f32.gmra.mrb[6].mxu1 %vm330_vm1, %v6029_v7  ;;  %5132 = vmatmul.mubr.msk.f32.gmra.mrb[22].mxu0 %vm330_vm1, %v6032_v9 }
  0x63   : > { %4910 = vmatprep.mubr.msk.f32.mxu1 %vm330_vm1, %v6035_v10  ;;  %5134 = vmatprep.mubr.msk.f32.mxu0 %vm330_vm1, %v6038_v55 }
  0x66   : > { %4911 = vmatmul.mubr.msk.f32.gmra.mrb[8].mxu1 %vm330_vm1, %v6049_v57  ;;  %5135 = vmatmul.mubr.msk.f32.gmra.mrb[24].mxu0 %vm330_vm1, %v6052_v53 }
  0x67   : > { %4913 = vmatprep.mubr.msk.f32.mxu1 %vm330_vm1, %v6055_v51  ;;  %5137 = vmatprep.mubr.msk.f32.mxu0 %vm330_vm1, %v6058_v49 }
  0x6a   : > { %4914 = vmatmul.mubr.msk.f32.gmra.mrb[10].mxu1 %vm330_vm1, %v6069_v47  ;;  %5138 = vmatmul.mubr.msk.f32.gmra.mrb[26].mxu0 %vm330_vm1, %v6072_v45 }
  0x6b   : > { %4916 = vmatprep.mubr.msk.f32.mxu1 %vm330_vm1, %v6075_v43  ;;  %5140 = vmatprep.mubr.msk.f32.mxu0 %vm330_vm1, %v6078_v41 }
  0x6e   : > { %4917 = vmatmul.mubr.msk.f32.gmra.mrb[12].mxu1 %vm330_vm1, %v6089_v39  ;;  %5141 = vmatmul.mubr.msk.f32.gmra.mrb[28].mxu0 %vm330_vm1, %v6092_v37  ;;  %v6134_v37 = vld [vmem:[%s6757_s1 + $0x20] sm:$0xf] }
  0x6f   : > { %4919 = vmatprep.mubr.msk.f32.mxu1 %vm330_vm1, %v6095_v35  ;;  %5143 = vmatprep.mubr.msk.f32.mxu0 %vm330_vm1, %v6098_v33  ;;  %v6126_v33 = vld [vmem:[%s5674_s30 + $0xc8] sm:$0xff] }
  0x70   : > { %6836 = vst [vmem:[#allocation32_spill] sm:$0xff] %v6126_v33 }
  0x72   : > { %4920 = vmatmul.mubr.msk.f32.gmra.mrb[14].mxu1 %vm330_vm1, %v6109_v62  ;;  %5144 = vmatmul.mubr.msk.f32.gmra.mrb[30].mxu0 %vm330_vm1, %v6112_v31  ;;  %v6145_v31 = vld [vmem:[%s5674_s30 + $0xe0] sm:$0xff] }
  0x73   : > { %4922 = vmatprep.mubr.msk.f32.mxu1 %vm330_vm1, %v6115_v59  ;;  %5148 = vmatprep.mubr.msk.f32.mxu0 %vm330_vm1, %v5993_v0  ;;  %v6150_v0 = vld [vmem:[%s5674_s30 + $0xf0] sm:$0xff] }
  0x76   : > { %4923 = vmatmul.mubr.msk.f32.gmra.mrb[16].mxu1 %vm330_vm1, %v6126_v33  ;;  %5149 = vmatmul.mubr.msk.f32.vlgmr.msra.gmra.mrb[0].mxu0 %vm330_vm1, %v6009_v3  ;;  %v980_v3 = vld [vmem:[%s5674_s30 + $0x2] sm:$0xff] }
  0x77   : > { %5197 = vmatpush3.msk.msra.mxu0 %vm427_vm0, %v5812_v28  ;;  %4925 = vmatprep.mubr.msk.f32.mxu1 %vm330_vm1, %v6129_v29  ;;  %v6163_v28 = vld [vmem:[%s5674_s30 + $0xf8] sm:$0xff] }
  0x78   : > { %5151 = vmatprep.mubr.msk.f32.mxu0 %vm330_vm1, %v6015_v5  ;;  %5246 = vmatprep.subr.msk.mxu0 %vm427_vm0, %v6134_v37  ;;  %v6166_v5 = vld [vmem:[%s5674_s30 + $0x108] sm:$0xff] }
  0x7a   : > { %4926 = vmatmul.mubr.msk.f32.gmra.mrb[18].mxu1 %vm330_vm1, %v6145_v31  ;;  %5152 = vmatmul.mubr.msk.f32.gmra.mrb[2].mxu0 %vm330_vm1, %v6029_v7  ;;  %v6177_v7 = vld [vmem:[%s5674_s30 + $0x110] sm:$0xff] }
  0x7b   : > { %4928 = vmatprep.mubr.msk.f32.mxu1 %vm330_vm1, %v6150_v0  ;;  %5154 = vmatprep.mubr.msk.f32.mxu0 %vm330_vm1, %v6035_v10  ;;  %v6180_v10 = vld [vmem:[%s5674_s30 + $0x120] sm:$0xff] }
  0x7e   : > { %4929 = vmatmul.mubr.msk.f32.gmra.mrb[20].mxu1 %vm330_vm1, %v6163_v28  ;;  %5155 = vmatmul.mubr.msk.f32.gmra.mrb[4].mxu0 %vm330_vm1, %v6049_v57  ;;  %v6191_v57 = vld [vmem:[%s5674_s30 + $0x128] sm:$0xff] }
  0x7f   : > { %4931 = vmatprep.mubr.msk.f32.mxu1 %vm330_vm1, %v6166_v5  ;;  %5157 = vmatprep.mubr.msk.f32.mxu0 %vm330_vm1, %v6055_v51  ;;  %v6194_v51 = vld [vmem:[%s5674_s30 + $0x138] sm:$0xff] }
  0x82   : > { %4932 = vmatmul.mubr.msk.f32.gmra.mrb[22].mxu1 %vm330_vm1, %v6177_v7  ;;  %5158 = vmatmul.mubr.msk.f32.gmra.mrb[6].mxu0 %vm330_vm1, %v6069_v47  ;;  %v6205_v47 = vld [vmem:[%s5674_s30 + $0x140] sm:$0xff] }
  0x83   : > { %4934 = vmatprep.mubr.msk.f32.mxu1 %vm330_vm1, %v6180_v10  ;;  %5160 = vmatprep.mubr.msk.f32.mxu0 %vm330_vm1, %v6075_v43  ;;  %v6208_v43 = vld [vmem:[%s5674_s30 + $0x150] sm:$0xff] }
  0x86   : > { %4935 = vmatmul.mubr.msk.f32.gmra.mrb[24].mxu1 %vm330_vm1, %v6191_v57  ;;  %5161 = vmatmul.mubr.msk.f32.gmra.mrb[8].mxu0 %vm330_vm1, %v6089_v39  ;;  %v6219_v39 = vld [vmem:[%s5674_s30 + $0x158] sm:$0xff] }
  0x87   : > { %4937 = vmatprep.mubr.msk.f32.mxu1 %vm330_vm1, %v6194_v51  ;;  %5163 = vmatprep.mubr.msk.f32.mxu0 %vm330_vm1, %v6095_v35  ;;  %v6222_v35 = vld [vmem:[%s5674_s30 + $0x168] sm:$0xff] }
  0x8a   : > { %4938 = vmatmul.mubr.msk.f32.gmra.mrb[26].mxu1 %vm330_vm1, %v6205_v47  ;;  %5164 = vmatmul.mubr.msk.f32.gmra.mrb[10].mxu0 %vm330_vm1, %v6109_v62  ;;  %v6233_v62 = vld [vmem:[%s5674_s30 + $0x170] sm:$0xff] }
  0x8b   : > { %4940 = vmatprep.mubr.msk.f32.mxu1 %vm330_vm1, %v6208_v43  ;;  %5166 = vmatprep.mubr.msk.f32.mxu0 %vm330_vm1, %v6115_v59 }
  0x8e   : > { %4941 = vmatmul.mubr.msk.f32.gmra.mrb[28].mxu1 %vm330_vm1, %v6219_v39  ;;  %5167 = vmatmul.mubr.msk.f32.gmra.mrb[12].mxu0 %vm330_vm1, %v6126_v33  ;;  %v981_v33 = vld [vmem:[%s5674_s30 + $0xa] sm:$0xff] }
  0x8f   : > { %4943 = vmatprep.mubr.msk.f32.mxu1 %vm330_vm1, %v6222_v35  ;;  %5169 = vmatprep.mubr.msk.f32.mxu0 %vm330_vm1, %v6129_v29 }
  0x92   : > { %4944 = vmatmul.mubr.msk.f32.gmra.mrb[30].mxu1 %vm330_vm1, %v6233_v62  ;;  %5170 = vmatmul.mubr.msk.f32.gmra.mrb[14].mxu0 %vm330_vm1, %v6145_v31 }
  0x93   : > { %4948 = vmatprep.mubr.msk.f32.mxu1 %vm330_vm1, %v980_v3  ;;  %5172 = vmatprep.mubr.msk.f32.mxu0 %vm330_vm1, %v6150_v0  ;;  %v6853_v3 = vld [vmem:[#allocation22_spill] sm:$0xff] }
  0x96   : > { %4949 = vmatmul.mubr.msk.f32.vlgmr.msra.gmra.mrb[0].mxu1 %vm330_vm1, %v981_v33  ;;  %5173 = vmatmul.mubr.msk.f32.gmra.mrb[16].mxu0 %vm330_vm1, %v6163_v28  ;;  %v4376_v33 = vld [vmem:[%s5674_s30 + $0x198] sm:$0xff] }
  0x97   : > { %4997 = vmatpush3.msk.msra.mxu1 %vm427_vm0, %v5975_v61  ;;  %4951 = vmatprep.mubr.msk.f32.mxu1 %vm330_vm1, %v5790_v24  ;;  %v6288_v24 = vld [vmem:[%s5674_s30 + $0x180] sm:$0xff] }
  0x98   : > { %5175 = vmatprep.mubr.msk.f32.mxu0 %vm330_vm1, %v6166_v5  ;;  %5296 = vmatprep.subr.msk.mxu1 %vm427_vm0, %v5652_v1  ;;  %v4377_v61 = vld [vmem:[%s5674_s30 + $0x1a0] sm:$0xff] }
  0x9a   : > { %4952 = vmatmul.mubr.msk.f32.gmra.mrb[2].mxu1 %vm330_vm1, %v5801_v25  ;;  %5176 = vmatmul.mubr.msk.f32.gmra.mrb[18].mxu0 %vm330_vm1, %v6177_v7  ;;  %v6299_v25 = vld [vmem:[%s5674_s30 + $0x188] sm:$0xff] }
  0x9b   : > { %4954 = vmatprep.mubr.msk.f32.mxu1 %vm330_vm1, %v5807_v27  ;;  %5178 = vmatprep.mubr.msk.f32.mxu0 %vm330_vm1, %v6180_v10 }
  0x9e   : > { %4955 = vmatmul.mubr.msk.f32.gmra.mrb[4].mxu1 %vm330_vm1, %v5825_v30  ;;  %5179 = vmatmul.mubr.msk.f32.gmra.mrb[20].mxu0 %vm330_vm1, %v6191_v57 }
  0x9f   : > { %4957 = vmatprep.mubr.msk.f32.mxu1 %vm330_vm1, %v5833_v32  ;;  %5181 = vmatprep.mubr.msk.f32.mxu0 %vm330_vm1, %v6194_v51 }
  0xa2   : > { %4958 = vmatmul.mubr.msk.f32.gmra.mrb[6].mxu1 %vm330_vm1, %v5849_v34  ;;  %5182 = vmatmul.mubr.msk.f32.gmra.mrb[22].mxu0 %vm330_vm1, %v6205_v47 }
  0xa3   : > { %4960 = vmatprep.mubr.msk.f32.mxu1 %vm330_vm1, %v5855_v36  ;;  %5184 = vmatprep.mubr.msk.f32.mxu0 %vm330_vm1, %v6208_v43 }
  0xa6   : > { %4961 = vmatmul.mubr.msk.f32.gmra.mrb[8].mxu1 %vm330_vm1, %v5869_v38  ;;  %5185 = vmatmul.mubr.msk.f32.gmra.mrb[24].mxu0 %vm330_vm1, %v6219_v39 }
  0xa7   : > { %4963 = vmatprep.mubr.msk.f32.mxu1 %vm330_vm1, %v5875_v40  ;;  %5187 = vmatprep.mubr.msk.f32.mxu0 %vm330_vm1, %v6222_v35 }
  0xaa   : > { %4964 = vmatmul.mubr.msk.f32.gmra.mrb[10].mxu1 %vm330_vm1, %v5889_v42  ;;  %5188 = vmatmul.mubr.msk.f32.gmra.mrb[26].mxu0 %vm330_vm1, %v6233_v62 }
  0xab   : > { %4966 = vmatprep.mubr.msk.f32.mxu1 %vm330_vm1, %v5895_v44  ;;  %5190 = vmatprep.mubr.msk.f32.mxu0 %vm330_vm1, %v6288_v24 }
  0xae   : > { %4967 = vmatmul.mubr.msk.f32.gmra.mrb[12].mxu1 %vm330_vm1, %v5909_v46  ;;  %5191 = vmatmul.mubr.msk.f32.gmra.mrb[28].mxu0 %vm330_vm1, %v6299_v25 }
  0xaf   : > { %4969 = vmatprep.mubr.msk.f32.mxu1 %vm330_vm1, %v5915_v48  ;;  %5193 = vmatprep.mubr.msk.f32.mxu0 %vm330_vm1, %v4376_v33  ;;  %v6854_v33 = vld [vmem:[#allocation10_spill] sm:$0xff] }
  0xb2   : > { %4970 = vmatmul.mubr.msk.f32.gmra.mrb[14].mxu1 %vm330_vm1, %v5929_v50  ;;  %5194 = vmatmul.mubr.msk.f32.gmra.mrb[30].mxu0 %vm330_vm1, %v4377_v61  ;;  %v6855_v61 = vld [vmem:[#allocation23_spill] sm:$0xff] }
  0xb3   : > { %4972 = vmatprep.mubr.msk.f32.mxu1 %vm330_vm1, %v5935_v52  ;;  %5198 = vmatprep.mubr.msk.f32.mxu0 %vm330_vm1, %v5683_v8  ;;  %v6837_v8 = vld [vmem:[#allocation27_spill] sm:$0xff] }
  0xb6   : > { %4973 = vmatmul.mubr.msk.f32.gmra.mrb[16].mxu1 %vm330_vm1, %v5949_v54  ;;  %5199 = vmatmul.mubr.msk.f32.vlgmr.msra.gmra.mrb[0].mxu0 %vm330_vm1, %v5698_v11  ;;  %v6838_v11 = vld [vmem:[#allocation2_spill] sm:$0xff] }
  0xb7   : > { %5247 = vmatpush3.msk.msra.mxu0 %vm427_vm0, %v6134_v37  ;;  %4975 = vmatprep.mubr.msk.f32.mxu1 %vm330_vm1, %v5953_v56  ;;  %v6852_v37 = vld [vmem:[#allocation9_spill] sm:$0xff] }
  0xb8   : > { %5201 = vmatprep.mubr.msk.f32.mxu0 %vm330_vm1, %v5704_v12  ;;  %v6839_v12 = vld [vmem:[#allocation15_spill] sm:$0xff] }
  0xba   : > { %4976 = vmatmul.mubr.msk.f32.gmra.mrb[18].mxu1 %vm330_vm1, %v5964_v58  ;;  %5202 = vmatmul.mubr.msk.f32.gmra.mrb[2].mxu0 %vm330_vm1, %v5717_v13  ;;  %v6840_v13 = vld [vmem:[#allocation3_spill] sm:$0xff] }
  0xbb   : > { %4978 = vmatprep.mubr.msk.f32.mxu1 %vm330_vm1, %v5970_v60  ;;  %5204 = vmatprep.mubr.msk.f32.mxu0 %vm330_vm1, %v5720_v14  ;;  %v6841_v14 = vld [vmem:[#allocation16_spill] sm:$0xff] }
  0xbe   : > { %4979 = vmatmul.mubr.msk.f32.gmra.mrb[20].mxu1 %vm330_vm1, %v5988_v63  ;;  %5205 = vmatmul.mubr.msk.f32.gmra.mrb[4].mxu0 %vm330_vm1, %v5731_v15  ;;  %v6842_v15 = vld [vmem:[#allocation4_spill] sm:$0xff] }
  0xbf   : > { %4981 = vmatprep.mubr.msk.f32.mxu1 %vm330_vm1, %v5996_v2  ;;  %5207 = vmatprep.mubr.msk.f32.mxu0 %vm330_vm1, %v5734_v16  ;;  %v6843_v16 = vld [vmem:[#allocation17_spill] sm:$0xff] }
  0xc2   : > { %4982 = vmatmul.mubr.msk.f32.gmra.mrb[22].mxu1 %vm330_vm1, %v6012_v4  ;;  %5208 = vmatmul.mubr.msk.f32.gmra.mrb[6].mxu0 %vm330_vm1, %v5745_v17  ;;  %v6844_v17 = vld [vmem:[#allocation5_spill] sm:$0xff] }
  0xc3   : > { %4984 = vmatprep.mubr.msk.f32.mxu1 %vm330_vm1, %v6018_v6  ;;  %5210 = vmatprep.mubr.msk.f32.mxu0 %vm330_vm1, %v5748_v18  ;;  %v6845_v18 = vld [vmem:[#allocation18_spill] sm:$0xff] }
  0xc6   : > { %4985 = vmatmul.mubr.msk.f32.gmra.mrb[24].mxu1 %vm330_vm1, %v6032_v9  ;;  %5211 = vmatmul.mubr.msk.f32.gmra.mrb[8].mxu0 %vm330_vm1, %v5759_v19  ;;  %v6846_v19 = vld [vmem:[#allocation6_spill] sm:$0xff] }
  0xc7   : > { %4987 = vmatprep.mubr.msk.f32.mxu1 %vm330_vm1, %v6038_v55  ;;  %5213 = vmatprep.mubr.msk.f32.mxu0 %vm330_vm1, %v5762_v20  ;;  %v6847_v20 = vld [vmem:[#allocation19_spill] sm:$0xff] }
  0xca   : > { %4988 = vmatmul.mubr.msk.f32.gmra.mrb[26].mxu1 %vm330_vm1, %v6052_v53  ;;  %5214 = vmatmul.mubr.msk.f32.gmra.mrb[10].mxu0 %vm330_vm1, %v5773_v21  ;;  %v6848_v21 = vld [vmem:[#allocation7_spill] sm:$0xff] }
  0xcb   : > { %4990 = vmatprep.mubr.msk.f32.mxu1 %vm330_vm1, %v6058_v49  ;;  %5216 = vmatprep.mubr.msk.f32.mxu0 %vm330_vm1, %v5776_v22  ;;  %v6850_v22 = vld [vmem:[#allocation8_spill] sm:$0xff] }
  0xce   : > { %4991 = vmatmul.mubr.msk.f32.gmra.mrb[28].mxu1 %vm330_vm1, %v6072_v45  ;;  %5217 = vmatmul.mubr.msk.f32.gmra.mrb[12].mxu0 %vm330_vm1, %v5787_v23  ;;  %v6851_v23 = vld [vmem:[#allocation21_spill] sm:$0xff] }
  0xcf   : > { %4993 = vmatprep.mubr.msk.f32.mxu1 %vm330_vm1, %v6078_v41  ;;  %5219 = vmatprep.mubr.msk.f32.mxu0 %vm330_vm1, %v5804_v26 }
  0xd2   : > { %4994 = vmatmul.mubr.msk.f32.gmra.mrb[30].mxu1 %vm330_vm1, %v6837_v8  ;;  %5220 = vmatmul.mubr.msk.f32.gmra.mrb[14].mxu0 %vm330_vm1, %v6838_v11  ;;  %v6864_v8 = vld [vmem:[#allocation30_spill] sm:$0xff] }
  0xd3   : > { %4998 = vmatprep.mubr.msk.f32.mxu1 %vm330_vm1, %v6839_v12  ;;  %5222 = vmatprep.mubr.msk.f32.mxu0 %vm330_vm1, %v6840_v13  ;;  %v6856_v12 = vld [vmem:[#allocation11_spill] sm:$0xff] }
  0xd6   : > { %4999 = vmatmul.mubr.msk.f32.vlgmr.msra.gmra.mrb[0].mxu1 %vm330_vm1, %v6841_v14  ;;  %5223 = vmatmul.mubr.msk.f32.gmra.mrb[16].mxu0 %vm330_vm1, %v6842_v15  ;;  %v6857_v14 = vld [vmem:[#allocation24_spill] sm:$0xff] }
  0xd7   : > { %5297 = vmatpush3.msk.msra.mxu1 %vm427_vm0, %v5652_v1  ;;  %5001 = vmatprep.mubr.msk.f32.mxu1 %vm330_vm1, %v6843_v16  ;;  %v6849_v1 = vld [vmem:[#allocation20_spill] sm:$0xff] }
  0xd8   : > { %5225 = vmatprep.mubr.msk.f32.mxu0 %vm330_vm1, %v6844_v17  ;;  %v6858_v16 = vld [vmem:[#allocation12_spill] sm:$0xff] }
  0xda   : > { %5002 = vmatmul.mubr.msk.f32.gmra.mrb[2].mxu1 %vm330_vm1, %v6845_v18  ;;  %5226 = vmatmul.mubr.msk.f32.gmra.mrb[18].mxu0 %vm330_vm1, %v6846_v19  ;;  %v6859_v18 = vld [vmem:[#allocation25_spill] sm:$0xff] }
  0xdb   : > { %5004 = vmatprep.mubr.msk.f32.mxu1 %vm330_vm1, %v6847_v20  ;;  %5228 = vmatprep.mubr.msk.f32.mxu0 %vm330_vm1, %v6848_v21  ;;  %v6860_v20 = vld [vmem:[#allocation13_spill] sm:$0xff] }
  0xde   : > { %5005 = vmatmul.mubr.msk.f32.gmra.mrb[4].mxu1 %vm330_vm1, %v6849_v1  ;;  %5229 = vmatmul.mubr.msk.f32.gmra.mrb[20].mxu0 %vm330_vm1, %v6850_v22  ;;  %v6426_v1 = vld [vmem:[%s5674_s30 + $0x181] sm:$0xff] }
  0xdf   : > { %5007 = vmatprep.mubr.msk.f32.mxu1 %vm330_vm1, %v6851_v23  ;;  %5231 = vmatprep.mubr.msk.f32.mxu0 %vm330_vm1, %v6852_v37  ;;  %v6861_v23 = vld [vmem:[#allocation26_spill] sm:$0xff] }
  0xe2   : > { %5008 = vmatmul.mubr.msk.f32.gmra.mrb[6].mxu1 %vm330_vm1, %v6853_v3  ;;  %5232 = vmatmul.mubr.msk.f32.gmra.mrb[22].mxu0 %vm330_vm1, %v6854_v33  ;;  %v6862_v3 = vld [vmem:[#allocation14_spill] sm:$0xff] }
  0xe3   : > { %5010 = vmatprep.mubr.msk.f32.mxu1 %vm330_vm1, %v6855_v61  ;;  %5234 = vmatprep.mubr.msk.f32.mxu0 %vm330_vm1, %v6856_v12  ;;  %v6863_v61 = vld [vmem:[#allocation28_spill] sm:$0xff] }
  0xe6   : > { %5011 = vmatmul.mubr.msk.f32.gmra.mrb[8].mxu1 %vm330_vm1, %v6857_v14  ;;  %5235 = vmatmul.mubr.msk.f32.gmra.mrb[24].mxu0 %vm330_vm1, %v6858_v16  ;;  %v6437_v14 = vld [vmem:[%s5674_s30 + $0x189] sm:$0xff] }
  0xe7   : > { %5013 = vmatprep.mubr.msk.f32.mxu1 %vm330_vm1, %v6859_v18  ;;  %5237 = vmatprep.mubr.msk.f32.mxu0 %vm330_vm1, %v6860_v20  ;;  %v4442_v18 = vld [vmem:[%s5674_s30 + $0x199] sm:$0xff] }
  0xea   : > { %5014 = vmatmul.mubr.msk.f32.gmra.mrb[10].mxu1 %vm330_vm1, %v6861_v23  ;;  %5238 = vmatmul.mubr.msk.f32.gmra.mrb[26].mxu0 %vm330_vm1, %v6862_v3  ;;  %v4443_v23 = vld [vmem:[%s5674_s30 + $0x1a1] sm:$0xff]  ;;  %v6865_v3 = vld [vmem:[#allocation32_spill] sm:$0xff] }
  0xeb   : > { %5016 = vmatprep.mubr.msk.f32.mxu1 %vm330_vm1, %v6863_v61  ;;  %5240 = vmatprep.mubr.msk.f32.mxu0 %vm330_vm1, %v6426_v1 }
  0xee   : > { %5017 = vmatmul.mubr.msk.f32.gmra.mrb[12].mxu1 %vm330_vm1, %v6864_v8  ;;  %5241 = vmatmul.mubr.msk.f32.gmra.mrb[28].mxu0 %vm330_vm1, %v6437_v14 }
  0xef   : > { %5019 = vmatprep.mubr.msk.f32.mxu1 %vm330_vm1, %v6115_v59  ;;  %5243 = vmatprep.mubr.msk.f32.mxu0 %vm330_vm1, %v4442_v18 }
  0xf2   : > { %5020 = vmatmul.mubr.msk.f32.gmra.mrb[14].mxu1 %vm330_vm1, %v6865_v3  ;;  %5244 = vmatmul.mubr.msk.f32.gmra.mrb[30].mxu0 %vm330_vm1, %v4443_v23 }
  0xf3   : > { %5022 = vmatprep.mubr.msk.f32.mxu1 %vm330_vm1, %v6129_v29  ;;  %5248 = vmatprep.mubr.msk.f32.mxu0 %vm330_vm1, %v5807_v27  ;;  %v6867_v27 = vld [vmem:[#allocation29_spill] sm:$0xff] }
  0xf4   : > { %v4508_v29 = vld [vmem:[%s5674_s30 + $0x19a] sm:$0xff] }
  0xf6   : > { %5023 = vmatmul.mubr.msk.f32.gmra.mrb[16].mxu1 %vm330_vm1, %v6145_v31  ;;  %5249 = vmatmul.mubr.msk.f32.vlgmr.msra.gmra.mrb[0].mxu0 %vm330_vm1, %v5825_v30  ;;  %v6868_v30 = vld [vmem:[#allocation14_spill] sm:$0xff]  ;;  %v6869_v31 = vld [vmem:[#allocation31_spill] sm:$0xff] }
  0xf7   : > { %5025 = vmatprep.mubr.msk.f32.mxu1 %vm330_vm1, %v6150_v0  ;;  %5251 = vmatprep.mubr.msk.f32.mxu0 %vm330_vm1, %v5833_v32  ;;  %v4509_v32 = vld [vmem:[%s5674_s30 + $0x1a2] sm:$0xff] }
  0xfa   : > { %5026 = vmatmul.mubr.msk.f32.gmra.mrb[18].mxu1 %vm330_vm1, %v6163_v28  ;;  %5252 = vmatmul.mubr.msk.f32.gmra.mrb[2].mxu0 %vm330_vm1, %v5849_v34 }
  0xfb   : > { %5028 = vmatprep.mubr.msk.f32.mxu1 %vm330_vm1, %v6166_v5  ;;  %5254 = vmatprep.mubr.msk.f32.mxu0 %vm330_vm1, %v5855_v36 }
  0xfe   : > { %5029 = vmatmul.mubr.msk.f32.gmra.mrb[20].mxu1 %vm330_vm1, %v6177_v7  ;;  %5255 = vmatmul.mubr.msk.f32.gmra.mrb[4].mxu0 %vm330_vm1, %v5869_v38 }
  0xff   : > { %5031 = vmatprep.mubr.msk.f32.mxu1 %vm330_vm1, %v6180_v10  ;;  %5257 = vmatprep.mubr.msk.f32.mxu0 %vm330_vm1, %v5875_v40 }
 0x102   : > { %5032 = vmatmul.mubr.msk.f32.gmra.mrb[22].mxu1 %vm330_vm1, %v6191_v57  ;;  %5258 = vmatmul.mubr.msk.f32.gmra.mrb[6].mxu0 %vm330_vm1, %v5889_v42 }
 0x103   : > { %5034 = vmatprep.mubr.msk.f32.mxu1 %vm330_vm1, %v6194_v51  ;;  %5260 = vmatprep.mubr.msk.f32.mxu0 %vm330_vm1, %v5895_v44 }
 0x106   : > { %5035 = vmatmul.mubr.msk.f32.gmra.mrb[24].mxu1 %vm330_vm1, %v6205_v47  ;;  %5261 = vmatmul.mubr.msk.f32.gmra.mrb[8].mxu0 %vm330_vm1, %v5909_v46 }
 0x107   : > { %5037 = vmatprep.mubr.msk.f32.mxu1 %vm330_vm1, %v6208_v43  ;;  %5263 = vmatprep.mubr.msk.f32.mxu0 %vm330_vm1, %v5915_v48 }
 0x10a   : > { %5038 = vmatmul.mubr.msk.f32.gmra.mrb[26].mxu1 %vm330_vm1, %v6219_v39  ;;  %5264 = vmatmul.mubr.msk.f32.gmra.mrb[10].mxu0 %vm330_vm1, %v5929_v50 }
 0x10b   : > { %5040 = vmatprep.mubr.msk.f32.mxu1 %vm330_vm1, %v6222_v35  ;;  %5266 = vmatprep.mubr.msk.f32.mxu0 %vm330_vm1, %v5935_v52  ;;  %v6598_v52 = vld [vmem:[%s6758_s2] ss:$0 sm:$0xff] }
 0x10e   : > { %5041 = vmatmul.mubr.msk.f32.gmra.mrb[28].mxu1 %vm330_vm1, %v6233_v62  ;;  %5267 = vmatmul.mubr.msk.f32.gmra.mrb[12].mxu0 %vm330_vm1, %v5949_v54 }
 0x10f   : > { %5043 = vmatprep.mubr.msk.f32.mxu1 %vm330_vm1, %v6288_v24  ;;  %5269 = vmatprep.mubr.msk.f32.mxu0 %vm330_vm1, %v5953_v56  ;;  %v6603_v56 = vld [vmem:[%s6759_s3] ss:$0 sm:$0xff] }
 0x112   : > { %5044 = vmatmul.mubr.msk.f32.gmra.mrb[30].mxu1 %vm330_vm1, %v6299_v25  ;;  %5270 = vmatmul.mubr.msk.f32.gmra.mrb[14].mxu0 %vm330_vm1, %v5964_v58 }
 0x113   : > { %5072 = vmatprep.mubr.msk.f32.mxu1 %vm330_vm1, %v5804_v26  ;;  %5272 = vmatprep.mubr.msk.f32.mxu0 %vm330_vm1, %v5970_v60  ;;  %v6866_v26 = vld [vmem:[#allocation27_spill] sm:$0xff] }
 0x116   : > { %5073 = vmatmul.mubr.msk.f32.vlgmr.msra.gmra.mrb[16].mxu1 %vm330_vm1, %v6838_v11  ;;  %5273 = vmatmul.mubr.msk.f32.gmra.mrb[16].mxu0 %vm330_vm1, %v5988_v63 }
 0x117   : > { %5075 = vmatprep.mubr.msk.f32.mxu1 %vm330_vm1, %v6840_v13  ;;  %5275 = vmatprep.mubr.msk.f32.mxu0 %vm330_vm1, %v5996_v2 }
 0x11a   : > { %5076 = vmatmul.mubr.msk.f32.gmra.mrb[18].mxu1 %vm330_vm1, %v6842_v15  ;;  %5276 = vmatmul.mubr.msk.f32.gmra.mrb[18].mxu0 %vm330_vm1, %v6012_v4 }
 0x11b   : > { %5078 = vmatprep.mubr.msk.f32.mxu1 %vm330_vm1, %v6844_v17  ;;  %5278 = vmatprep.mubr.msk.f32.mxu0 %vm330_vm1, %v6018_v6 }
 0x11e   : > { %5079 = vmatmul.mubr.msk.f32.gmra.mrb[20].mxu1 %vm330_vm1, %v6846_v19  ;;  %5279 = vmatmul.mubr.msk.f32.gmra.mrb[20].mxu0 %vm330_vm1, %v6032_v9 }
 0x11f   : > { %5081 = vmatprep.mubr.msk.f32.mxu1 %vm330_vm1, %v6848_v21  ;;  %5281 = vmatprep.mubr.msk.f32.mxu0 %vm330_vm1, %v6038_v55 }
 0x122   : > { %5082 = vmatmul.mubr.msk.f32.gmra.mrb[22].mxu1 %vm330_vm1, %v6850_v22  ;;  %5282 = vmatmul.mubr.msk.f32.gmra.mrb[22].mxu0 %vm330_vm1, %v6052_v53 }
 0x123   : > { %5084 = vmatprep.mubr.msk.f32.mxu1 %vm330_vm1, %v6852_v37  ;;  %5284 = vmatprep.mubr.msk.f32.mxu0 %vm330_vm1, %v6058_v49 }
 0x126   : > { %5085 = vmatmul.mubr.msk.f32.gmra.mrb[24].mxu1 %vm330_vm1, %v6854_v33  ;;  %5285 = vmatmul.mubr.msk.f32.gmra.mrb[24].mxu0 %vm330_vm1, %v6072_v45 }
 0x127   : > { %5087 = vmatprep.mubr.msk.f32.mxu1 %vm330_vm1, %v6856_v12  ;;  %5287 = vmatprep.mubr.msk.f32.mxu0 %vm330_vm1, %v6078_v41 }
 0x12a   : > { %5088 = vmatmul.mubr.msk.f32.gmra.mrb[26].mxu1 %vm330_vm1, %v6858_v16  ;;  %5288 = vmatmul.mubr.msk.f32.gmra.mrb[26].mxu0 %vm330_vm1, %v6866_v26 }
 0x12b   : > { %5090 = vmatprep.mubr.msk.f32.mxu1 %vm330_vm1, %v6860_v20  ;;  %5290 = vmatprep.mubr.msk.f32.mxu0 %vm330_vm1, %v6867_v27 }
 0x12e   : > { %5091 = vmatmul.mubr.msk.f32.gmra.mrb[28].mxu1 %vm330_vm1, %v6868_v30  ;;  %5291 = vmatmul.mubr.msk.f32.gmra.mrb[28].mxu0 %vm330_vm1, %v6869_v31 }
 0x12f   : > { %5093 = vmatprep.mubr.msk.f32.mxu1 %vm330_vm1, %v6426_v1  ;;  %5293 = vmatprep.mubr.msk.f32.mxu0 %vm330_vm1, %v4508_v29 }
 0x132   : > { %5094 = vmatmul.mubr.msk.f32.gmra.mrb[30].mxu1 %vm330_vm1, %v6437_v14  ;;  %5294 = vmatmul.mubr.msk.f32.gmra.mrb[30].mxu0 %vm330_vm1, %v4509_v32 }
 0x1a9   : > { %v5000_v34 = vpop.f32.mrb[0].mxu1 }
 0x1aa   : > { %v1570_v35 = vpop.f32.mrb[1].mxu1 }
 0x1ad   : > { %v5003_v36 = vpop.f32.mrb[2].mxu1 }
 0x1ae   : > { %v1580_v38 = vpop.f32.mrb[3].mxu1 }
 0x1b1   : > { %v5006_v39 = vpop.f32.mrb[4].mxu1 }
 0x1b2   : > { %v1590_v40 = vpop.f32.mrb[5].mxu1 }
 0x1b5   : > { %v5009_v41 = vpop.f32.mrb[6].mxu1 }
 0x1b6   : > { %v1600_v42 = vpop.f32.mrb[7].mxu1 }
 0x1b9   : > { %v6579_v43 = vpop.f32.mrb[8].mxu1 }
 0x1ba   : > { %v6581_v44 = vpop.f32.mrb[9].mxu1 }
 0x1bd   : > { %v6583_v45 = vpop.f32.mrb[10].mxu1 }
 0x1be   : > { %v6585_v46 = vpop.f32.mrb[11].mxu1 }
 0x1c1   : > { %v6587_v47 = vpop.f32.mrb[12].mxu1 }
 0x1c2   : > { %v6589_v48 = vpop.f32.mrb[13].mxu1 }
 0x1c5   : > { %v6591_v49 = vpop.f32.mrb[14].mxu1 }
 0x1c6   : > { %v6593_v50 = vpop.f32.mrb[15].mxu1 }
 0x1c9   : > { %v5250_v51 = vpop.f32.mrb[0].mxu0 }
 0x1ca   : > { %v5298_v53 = vadd.f32 %v5250_v51, %v5000_v34  ;;  %v3521_v54 = vpop.f32.mrb[1].mxu0 }
 0x1cb   : > { %v5299_v58 = vadd.f32 %v3521_v54, %v1570_v35 }
 0x1cc   : > { %v3720_v59 = vmul.f32 %v5298_v53, %v6598_v52 }
 0x1cd   : > { %v3719_v60 = vmul.f32 %v5299_v58, %v6598_v52  ;;  %v5253_v62 = vpop.f32.mrb[2].mxu0 }
 0x1ce   : > { %v3759_v63 = vadd.f32 %v6603_v56, %v3720_v59  ;;  %v5300_v0 = vadd.f32 %v5253_v62, %v5003_v36  ;;  %v3531_v2 = vpop.f32.mrb[3].mxu0 }
 0x1cf   : > { %v3758_v4 = vadd.f32 %v6603_v56, %v3719_v60  ;;  %v5301_v5 = vadd.f32 %v3531_v2, %v1580_v38 }
 0x1d0   : > { %vm3791_vm2 = vcmp.ge.f32.partialorder %v3759_v63, 0.0  ;;  %v3823_v6 = vmul.f32 0.01, %v3759_v63  ;;  %v3722_v7 = vmul.f32 %v5300_v0, %v6598_v52 }
 0x1d1   : > { %vm3790_vm4 = vcmp.ge.f32.partialorder %v3758_v4, 0.0  ;;  %v3822_v9 = vmul.f32 0.01, %v3758_v4  ;;  %v3721_v10 = vmul.f32 %v5301_v5, %v6598_v52  ;;  %v5256_v55 = vpop.f32.mrb[4].mxu0 }
 0x1d2   : > { %v3855_v57 = vsel %vm3791_vm2, %v3759_v63, %v3823_v6  ;;  %v3761_v28 = vadd.f32 %v6603_v56, %v3722_v7  ;;  %v5302_v24 = vadd.f32 %v5256_v55, %v5006_v39  ;;  %v3541_v25 = vpop.f32.mrb[5].mxu0 }
 0x1d3   : > { %3888 = vst.msk [vmem:[%s6613_s26 + $0x8] sm:$0xff] %vm3886_vm3, %v3855_v57  ;;  %v3854_v8 = vsel %vm3790_vm4, %v3758_v4, %v3822_v9  ;;  %v3760_v11 = vadd.f32 %v6603_v56, %v3721_v10  ;;  %v5303_v13 = vadd.f32 %v3541_v25, %v1590_v40 }
 0x1d4   : > { %3887 = vst.msk [vmem:[%s6613_s26] sm:$0xff] %vm3886_vm3, %v3854_v8  ;;  %vm3793_vm5 = vcmp.ge.f32.partialorder %v3761_v28, 0.0  ;;  %v3825_v15 = vmul.f32 0.01, %v3761_v28  ;;  %v3724_v17 = vmul.f32 %v5302_v24, %v6598_v52 }
 0x1d5   : > { %vm3792_vm6 = vcmp.ge.f32.partialorder %v3760_v11, 0.0  ;;  %v3824_v19 = vmul.f32 0.01, %v3760_v11  ;;  %v3723_v21 = vmul.f32 %v5303_v13, %v6598_v52  ;;  %v5259_v22 = vpop.f32.mrb[6].mxu0 }
 0x1d6   : > { %v3857_v37 = vsel %vm3793_vm5, %v3761_v28, %v3825_v15  ;;  %v3763_v33 = vadd.f32 %v6603_v56, %v3724_v17  ;;  %v5304_v12 = vadd.f32 %v5259_v22, %v5009_v41  ;;  %v3551_v16 = vpop.f32.mrb[7].mxu0 }
 0x1d7   : > { %3890 = vst.msk [vmem:[%s6613_s26 + $0x18] sm:$0xff] %vm3886_vm3, %v3857_v37  ;;  %v3856_v20 = vsel %vm3792_vm6, %v3760_v11, %v3824_v19  ;;  %v3762_v1 = vadd.f32 %v6603_v56, %v3723_v21  ;;  %v5305_v3 = vadd.f32 %v3551_v16, %v1600_v42 }
 0x1d8   : > { %3889 = vst.msk [vmem:[%s6613_s26 + $0x10] sm:$0xff] %vm3886_vm3, %v3856_v20  ;;  %vm3795_vm7 = vcmp.ge.f32.partialorder %v3763_v33, 0.0  ;;  %v3827_v61 = vmul.f32 0.01, %v3763_v33  ;;  %v3726_v14 = vmul.f32 %v5304_v12, %v6598_v52 }
 0x1d9   : > { %vm3794_vm8 = vcmp.ge.f32.partialorder %v3762_v1, 0.0  ;;  %v3826_v18 = vmul.f32 0.01, %v3762_v1  ;;  %v3725_v23 = vmul.f32 %v5305_v3, %v6598_v52  ;;  %v5262_v26 = vpop.f32.mrb[8].mxu0 }
 0x1da   : > { %v3859_v27 = vsel %vm3795_vm7, %v3763_v33, %v3827_v61  ;;  %v3765_v29 = vadd.f32 %v6603_v56, %v3726_v14  ;;  %v5306_v30 = vadd.f32 %v5262_v26, %v6579_v43  ;;  %v3561_v31 = vpop.f32.mrb[9].mxu0 }
 0x1db   : > { %3892 = vst.msk [vmem:[%s6613_s26 + $0x28] sm:$0xff] %vm3886_vm3, %v3859_v27  ;;  %v3858_v32 = vsel %vm3794_vm8, %v3762_v1, %v3826_v18  ;;  %v3764_v34 = vadd.f32 %v6603_v56, %v3725_v23  ;;  %v5307_v35 = vadd.f32 %v3561_v31, %v6581_v44 }
 0x1dc   : > { %3891 = vst.msk [vmem:[%s6613_s26 + $0x20] sm:$0xff] %vm3886_vm3, %v3858_v32  ;;  %vm3797_vm9 = vcmp.ge.f32.partialorder %v3765_v29, 0.0  ;;  %v3829_v36 = vmul.f32 0.01, %v3765_v29  ;;  %v3728_v38 = vmul.f32 %v5306_v30, %v6598_v52 }
 0x1dd   : > { %vm3796_vm10 = vcmp.ge.f32.partialorder %v3764_v34, 0.0  ;;  %v3828_v39 = vmul.f32 0.01, %v3764_v34  ;;  %v3727_v40 = vmul.f32 %v5307_v35, %v6598_v52  ;;  %v5265_v41 = vpop.f32.mrb[10].mxu0 }
 0x1de   : > { %v3861_v42 = vsel %vm3797_vm9, %v3765_v29, %v3829_v36  ;;  %v3767_v43 = vadd.f32 %v6603_v56, %v3728_v38  ;;  %v5308_v51 = vadd.f32 %v5265_v41, %v6583_v45  ;;  %v3571_v53 = vpop.f32.mrb[11].mxu0 }
 0x1df   : > { %3894 = vst.msk [vmem:[%s6613_s26 + $0x38] sm:$0xff] %vm3886_vm3, %v3861_v42  ;;  %v3860_v44 = vsel %vm3796_vm10, %v3764_v34, %v3828_v39  ;;  %v3766_v54 = vadd.f32 %v6603_v56, %v3727_v40  ;;  %v5309_v58 = vadd.f32 %v3571_v53, %v6585_v46 }
 0x1e0   : > { %3893 = vst.msk [vmem:[%s6613_s26 + $0x30] sm:$0xff] %vm3886_vm3, %v3860_v44  ;;  %vm3799_vm11 = vcmp.ge.f32.partialorder %v3767_v43, 0.0  ;;  %v3831_v59 = vmul.f32 0.01, %v3767_v43  ;;  %v3730_v60 = vmul.f32 %v5308_v51, %v6598_v52 }
 0x1e1   : > { %vm3798_vm12 = vcmp.ge.f32.partialorder %v3766_v54, 0.0  ;;  %v3830_v62 = vmul.f32 0.01, %v3766_v54  ;;  %v3729_v45 = vmul.f32 %v5309_v58, %v6598_v52  ;;  %v5268_v63 = vpop.f32.mrb[12].mxu0 }
 0x1e2   : > { %v3863_v0 = vsel %vm3799_vm11, %v3767_v43, %v3831_v59  ;;  %v3769_v2 = vadd.f32 %v6603_v56, %v3730_v60  ;;  %v5310_v4 = vadd.f32 %v5268_v63, %v6587_v47  ;;  %v3581_v5 = vpop.f32.mrb[13].mxu0 }
 0x1e3   : > { %3896 = vst.msk [vmem:[%s6613_s26 + $0x48] sm:$0xff] %vm3886_vm3, %v3863_v0  ;;  %v3862_v46 = vsel %vm3798_vm12, %v3766_v54, %v3830_v62  ;;  %v3768_v6 = vadd.f32 %v6603_v56, %v3729_v45  ;;  %v5311_v7 = vadd.f32 %v3581_v5, %v6589_v48 }
 0x1e4   : > { %3895 = vst.msk [vmem:[%s6613_s26 + $0x40] sm:$0xff] %vm3886_vm3, %v3862_v46  ;;  %vm3801_vm13 = vcmp.ge.f32.partialorder %v3769_v2, 0.0  ;;  %v3833_v9 = vmul.f32 0.01, %v3769_v2  ;;  %v3732_v10 = vmul.f32 %v5310_v4, %v6598_v52 }
 0x1e5   : > { %vm3800_vm14 = vcmp.ge.f32.partialorder %v3768_v6, 0.0  ;;  %v3832_v55 = vmul.f32 0.01, %v3768_v6  ;;  %v3731_v47 = vmul.f32 %v5311_v7, %v6598_v52  ;;  %v5271_v57 = vpop.f32.mrb[14].mxu0 }
 0x1e6   : > { %v3865_v28 = vsel %vm3801_vm13, %v3769_v2, %v3833_v9  ;;  %v3771_v24 = vadd.f32 %v6603_v56, %v3732_v10  ;;  %v5312_v25 = vadd.f32 %v5271_v57, %v6591_v49  ;;  %v3591_v8 = vpop.f32.mrb[15].mxu0 }
 0x1e7   : > { %3898 = vst.msk [vmem:[%s6613_s26 + $0x58] sm:$0xff] %vm3886_vm3, %v3865_v28  ;;  %v3864_v48 = vsel %vm3800_vm14, %v3768_v6, %v3832_v55  ;;  %v3770_v11 = vadd.f32 %v6603_v56, %v3731_v47  ;;  %v5313_v13 = vadd.f32 %v3591_v8, %v6593_v50 }
 0x1e8   : > { %3897 = vst.msk [vmem:[%s6613_s26 + $0x50] sm:$0xff] %vm3886_vm3, %v3864_v48  ;;  %vm3803_vm15 = vcmp.ge.f32.partialorder %v3771_v24, 0.0  ;;  %v3835_v15 = vmul.f32 0.01, %v3771_v24  ;;  %v3734_v17 = vmul.f32 %v5312_v25, %v6598_v52 }
 0x1e9   : > { %vm3802_vm0 = vcmp.ge.f32.partialorder %v3770_v11, 0.0  ;;  %v3834_v19 = vmul.f32 0.01, %v3770_v11  ;;  %v3733_v49 = vmul.f32 %v5313_v13, %v6598_v52  ;;  %v5074_v21 = vpop.f32.mrb[16].mxu1  ;;  %v5274_v22 = vpop.f32.mrb[16].mxu0 }
 0x1ea   : > { %v3867_v37 = vsel %vm3803_vm15, %v3771_v24, %v3835_v15  ;;  %v3773_v33 = vadd.f32 %v6603_v56, %v3734_v17  ;;  %v5314_v12 = vadd.f32 %v5274_v22, %v5074_v21  ;;  %v2040_v16 = vpop.f32.mrb[17].mxu1  ;;  %v3601_v20 = vpop.f32.mrb[17].mxu0 }
 0x1eb   : > { %3900 = vst.msk [vmem:[%s6613_s26 + $0x68] sm:$0xff] %vm3886_vm3, %v3867_v37  ;;  %v3866_v50 = vsel %vm3802_vm0, %v3770_v11, %v3834_v19  ;;  %v3772_v1 = vadd.f32 %v6603_v56, %v3733_v49  ;;  %v5315_v3 = vadd.f32 %v3601_v20, %v2040_v16 }
 0x1ec   : > { %3899 = vst.msk [vmem:[%s6613_s26 + $0x60] sm:$0xff] %vm3886_vm3, %v3866_v50  ;;  %vm3805_vm1 = vcmp.ge.f32.partialorder %v3773_v33, 0.0  ;;  %v3837_v61 = vmul.f32 0.01, %v3773_v33  ;;  %v3736_v14 = vmul.f32 %v5314_v12, %v6598_v52 }
 0x1ed   : > { %vm3804_vm2 = vcmp.ge.f32.partialorder %v3772_v1, 0.0  ;;  %v3836_v18 = vmul.f32 0.01, %v3772_v1  ;;  %v3735_v23 = vmul.f32 %v5315_v3, %v6598_v52  ;;  %v5077_v26 = vpop.f32.mrb[18].mxu1  ;;  %v5277_v27 = vpop.f32.mrb[18].mxu0 }
 0x1ee   : > { %v3869_v29 = vsel %vm3805_vm1, %v3773_v33, %v3837_v61  ;;  %v3775_v30 = vadd.f32 %v6603_v56, %v3736_v14  ;;  %v5316_v31 = vadd.f32 %v5277_v27, %v5077_v26  ;;  %v2050_v32 = vpop.f32.mrb[19].mxu1  ;;  %v3611_v34 = vpop.f32.mrb[19].mxu0 }
 0x1ef   : > { %3902 = vst.msk [vmem:[%s6613_s26 + $0x78] sm:$0xff] %vm3886_vm3, %v3869_v29  ;;  %v3868_v35 = vsel %vm3804_vm2, %v3772_v1, %v3836_v18  ;;  %v3774_v36 = vadd.f32 %v6603_v56, %v3735_v23  ;;  %v5317_v38 = vadd.f32 %v3611_v34, %v2050_v32 }
 0x1f0   : > { %3901 = vst.msk [vmem:[%s6613_s26 + $0x70] sm:$0xff] %vm3886_vm3, %v3868_v35  ;;  %vm3807_vm4 = vcmp.ge.f32.partialorder %v3775_v30, 0.0  ;;  %v3839_v39 = vmul.f32 0.01, %v3775_v30  ;;  %v3738_v40 = vmul.f32 %v5316_v31, %v6598_v52 }
 0x1f1   : > { %vm3806_vm5 = vcmp.ge.f32.partialorder %v3774_v36, 0.0  ;;  %v3838_v41 = vmul.f32 0.01, %v3774_v36  ;;  %v3737_v42 = vmul.f32 %v5317_v38, %v6598_v52  ;;  %v5080_v43 = vpop.f32.mrb[20].mxu1  ;;  %v5280_v51 = vpop.f32.mrb[20].mxu0 }
 0x1f2   : > { %v3871_v53 = vsel %vm3807_vm4, %v3775_v30, %v3839_v39  ;;  %v3777_v44 = vadd.f32 %v6603_v56, %v3738_v40  ;;  %v5318_v54 = vadd.f32 %v5280_v51, %v5080_v43  ;;  %v2060_v58 = vpop.f32.mrb[21].mxu1  ;;  %v3621_v59 = vpop.f32.mrb[21].mxu0 }
 0x1f3   : > { %3904 = vst.msk [vmem:[%s6613_s26 + $0x88] sm:$0xff] %vm3886_vm3, %v3871_v53  ;;  %v3870_v60 = vsel %vm3806_vm5, %v3774_v36, %v3838_v41  ;;  %v3776_v62 = vadd.f32 %v6603_v56, %v3737_v42  ;;  %v5319_v45 = vadd.f32 %v3621_v59, %v2060_v58 }
 0x1f4   : > { %3903 = vst.msk [vmem:[%s6613_s26 + $0x80] sm:$0xff] %vm3886_vm3, %v3870_v60  ;;  %vm3809_vm6 = vcmp.ge.f32.partialorder %v3777_v44, 0.0  ;;  %v3841_v63 = vmul.f32 0.01, %v3777_v44  ;;  %v3740_v0 = vmul.f32 %v5318_v54, %v6598_v52 }
 0x1f5   : > { %vm3808_vm7 = vcmp.ge.f32.partialorder %v3776_v62, 0.0  ;;  %v3840_v2 = vmul.f32 0.01, %v3776_v62  ;;  %v3739_v4 = vmul.f32 %v5319_v45, %v6598_v52  ;;  %v5083_v5 = vpop.f32.mrb[22].mxu1  ;;  %v5283_v46 = vpop.f32.mrb[22].mxu0 }
 0x1f6   : > { %v3873_v6 = vsel %vm3809_vm6, %v3777_v44, %v3841_v63  ;;  %v3779_v7 = vadd.f32 %v6603_v56, %v3740_v0  ;;  %v5320_v9 = vadd.f32 %v5283_v46, %v5083_v5  ;;  %v2070_v10 = vpop.f32.mrb[23].mxu1  ;;  %v3631_v55 = vpop.f32.mrb[23].mxu0 }
 0x1f7   : > { %3906 = vst.msk [vmem:[%s6613_s26 + $0x98] sm:$0xff] %vm3886_vm3, %v3873_v6  ;;  %v3872_v47 = vsel %vm3808_vm7, %v3776_v62, %v3840_v2  ;;  %v3778_v57 = vadd.f32 %v6603_v56, %v3739_v4  ;;  %v5321_v28 = vadd.f32 %v3631_v55, %v2070_v10 }
 0x1f8   : > { %3905 = vst.msk [vmem:[%s6613_s26 + $0x90] sm:$0xff] %vm3886_vm3, %v3872_v47  ;;  %vm3811_vm8 = vcmp.ge.f32.partialorder %v3779_v7, 0.0  ;;  %v3843_v24 = vmul.f32 0.01, %v3779_v7  ;;  %v3742_v25 = vmul.f32 %v5320_v9, %v6598_v52 }
 0x1f9   : > { %vm3810_vm9 = vcmp.ge.f32.partialorder %v3778_v57, 0.0  ;;  %v3842_v8 = vmul.f32 0.01, %v3778_v57  ;;  %v3741_v48 = vmul.f32 %v5321_v28, %v6598_v52  ;;  %v5086_v11 = vpop.f32.mrb[24].mxu1  ;;  %v5286_v13 = vpop.f32.mrb[24].mxu0 }
 0x1fa   : > { %v3875_v15 = vsel %vm3811_vm8, %v3779_v7, %v3843_v24  ;;  %v3781_v17 = vadd.f32 %v6603_v56, %v3742_v25  ;;  %v5322_v19 = vadd.f32 %v5286_v13, %v5086_v11  ;;  %v2080_v49 = vpop.f32.mrb[25].mxu1  ;;  %v3641_v21 = vpop.f32.mrb[25].mxu0 }
 0x1fb   : > { %3908 = vst.msk [vmem:[%s6613_s26 + $0xa8] sm:$0xff] %vm3886_vm3, %v3875_v15  ;;  %v3874_v22 = vsel %vm3810_vm9, %v3778_v57, %v3842_v8  ;;  %v3780_v37 = vadd.f32 %v6603_v56, %v3741_v48  ;;  %v5323_v33 = vadd.f32 %v3641_v21, %v2080_v49 }
 0x1fc   : > { %3907 = vst.msk [vmem:[%s6613_s26 + $0xa0] sm:$0xff] %vm3886_vm3, %v3874_v22  ;;  %vm3813_vm10 = vcmp.ge.f32.partialorder %v3781_v17, 0.0  ;;  %v3845_v12 = vmul.f32 0.01, %v3781_v17  ;;  %v3744_v16 = vmul.f32 %v5322_v19, %v6598_v52 }
 0x1fd   : > { %vm3812_vm11 = vcmp.ge.f32.partialorder %v3780_v37, 0.0  ;;  %v3844_v20 = vmul.f32 0.01, %v3780_v37  ;;  %v3743_v50 = vmul.f32 %v5323_v33, %v6598_v52  ;;  %v5089_v1 = vpop.f32.mrb[26].mxu1  ;;  %v5289_v3 = vpop.f32.mrb[26].mxu0 }
 0x1fe   : > { %v3877_v61 = vsel %vm3813_vm10, %v3781_v17, %v3845_v12  ;;  %v3783_v14 = vadd.f32 %v6603_v56, %v3744_v16  ;;  %v5324_v18 = vadd.f32 %v5289_v3, %v5089_v1  ;;  %v2090_v23 = vpop.f32.mrb[27].mxu1  ;;  %v3651_v26 = vpop.f32.mrb[27].mxu0 }
 0x1ff   : > { %3910 = vst.msk [vmem:[%s6613_s26 + $0xb8] sm:$0xff] %vm3886_vm3, %v3877_v61  ;;  %v3876_v27 = vsel %vm3812_vm11, %v3780_v37, %v3844_v20  ;;  %v3782_v29 = vadd.f32 %v6603_v56, %v3743_v50  ;;  %v5325_v30 = vadd.f32 %v3651_v26, %v2090_v23 }
 0x200   : > { %3909 = vst.msk [vmem:[%s6613_s26 + $0xb0] sm:$0xff] %vm3886_vm3, %v3876_v27  ;;  %vm3815_vm12 = vcmp.ge.f32.partialorder %v3783_v14, 0.0  ;;  %v3847_v31 = vmul.f32 0.01, %v3783_v14  ;;  %v3746_v32 = vmul.f32 %v5324_v18, %v6598_v52 }
 0x201   : > { %vm3814_vm13 = vcmp.ge.f32.partialorder %v3782_v29, 0.0  ;;  %v3846_v34 = vmul.f32 0.01, %v3782_v29  ;;  %v3745_v35 = vmul.f32 %v5325_v30, %v6598_v52  ;;  %v5092_v36 = vpop.f32.mrb[28].mxu1  ;;  %v5292_v38 = vpop.f32.mrb[28].mxu0 }
 0x202   : > { %v3879_v39 = vsel %vm3815_vm12, %v3783_v14, %v3847_v31  ;;  %v3785_v40 = vadd.f32 %v6603_v56, %v3746_v32  ;;  %v5326_v41 = vadd.f32 %v5292_v38, %v5092_v36  ;;  %v2100_v42 = vpop.f32.mrb[29].mxu1  ;;  %v3661_v43 = vpop.f32.mrb[29].mxu0 }
 0x203   : > { %3912 = vst.msk [vmem:[%s6613_s26 + $0xc8] sm:$0xff] %vm3886_vm3, %v3879_v39  ;;  %v3878_v51 = vsel %vm3814_vm13, %v3782_v29, %v3846_v34  ;;  %v3784_v53 = vadd.f32 %v6603_v56, %v3745_v35  ;;  %v5327_v44 = vadd.f32 %v3661_v43, %v2100_v42 }
 0x204   : > { %3911 = vst.msk [vmem:[%s6613_s26 + $0xc0] sm:$0xff] %vm3886_vm3, %v3878_v51  ;;  %vm3817_vm14 = vcmp.ge.f32.partialorder %v3785_v40, 0.0  ;;  %v3849_v54 = vmul.f32 0.01, %v3785_v40  ;;  %v3748_v58 = vmul.f32 %v5326_v41, %v6598_v52 }
 0x205   : > { %vm3816_vm15 = vcmp.ge.f32.partialorder %v3784_v53, 0.0  ;;  %v3848_v59 = vmul.f32 0.01, %v3784_v53  ;;  %v3747_v60 = vmul.f32 %v5327_v44, %v6598_v52  ;;  %v5095_v62 = vpop.f32.mrb[30].mxu1  ;;  %v5295_v45 = vpop.f32.mrb[30].mxu0 }
 0x206   : > { %v3881_v63 = vsel %vm3817_vm14, %v3785_v40, %v3849_v54  ;;  %v3787_v0 = vadd.f32 %v6603_v56, %v3748_v58  ;;  %v5328_v2 = vadd.f32 %v5295_v45, %v5095_v62  ;;  %v2110_v4 = vpop.f32.mrb[31].mxu1  ;;  %v3671_v5 = vpop.f32.mrb[31].mxu0 }
 0x207   : > { %3914 = vst.msk [vmem:[%s6613_s26 + $0xd8] sm:$0xff] %vm3886_vm3, %v3881_v63  ;;  %v3880_v46 = vsel %vm3816_vm15, %v3784_v53, %v3848_v59  ;;  %v3786_v6 = vadd.f32 %v6603_v56, %v3747_v60  ;;  %v5329_v7 = vadd.f32 %v3671_v5, %v2110_v4 }
 0x208   : > { %3913 = vst.msk [vmem:[%s6613_s26 + $0xd0] sm:$0xff] %vm3886_vm3, %v3880_v46  ;;  %vm3819_vm0 = vcmp.ge.f32.partialorder %v3787_v0, 0.0  ;;  %v3851_v9 = vmul.f32 0.01, %v3787_v0  ;;  %v3750_v10 = vmul.f32 %v5328_v2, %v6598_v52 }
 0x209   : > { %vm3818_vm1 = vcmp.ge.f32.partialorder %v3786_v6, 0.0  ;;  %v3850_v55 = vmul.f32 0.01, %v3786_v6  ;;  %v3749_v47 = vmul.f32 %v5329_v7, %v6598_v52 }
 0x20a   : > { %v3883_v57 = vsel %vm3819_vm0, %v3787_v0, %v3851_v9  ;;  %v3789_v28 = vadd.f32 %v6603_v56, %v3750_v10 }
 0x20b   : > { %3916 = vst.msk [vmem:[%s6613_s26 + $0xe8] sm:$0xff] %vm3886_vm3, %v3883_v57  ;;  %v3882_v24 = vsel %vm3818_vm1, %v3786_v6, %v3850_v55  ;;  %v3788_v25 = vadd.f32 %v6603_v56, %v3749_v47 }
 0x20c   : > { %3915 = vst.msk [vmem:[%s6613_s26 + $0xe0] sm:$0xff] %vm3886_vm3, %v3882_v24  ;;  %vm3821_vm2 = vcmp.ge.f32.partialorder %v3789_v28, 0.0  ;;  %v3853_v8 = vmul.f32 0.01, %v3789_v28 }
 0x20d   : > { %vm3820_vm4 = vcmp.ge.f32.partialorder %v3788_v25, 0.0  ;;  %v3852_v48 = vmul.f32 0.01, %v3788_v25 }
 0x20e   : > { %v3885_v11 = vsel %vm3821_vm2, %v3789_v28, %v3853_v8 }
 0x20f   : > { %3918 = vst.msk [vmem:[%s6613_s26 + $0xf8] sm:$0xff] %vm3886_vm3, %v3885_v11  ;;  %v3884_v13 = vsel %vm3820_vm4, %v3788_v25, %v3852_v48 }
 0x210   : > { %3917 = vst.msk [vmem:[%s6613_s26 + $0xf0] sm:$0xff] %vm3886_vm3, %v3884_v13 }
 0x211 PF: > { %s14_s17 = sadd.s32 1, %s5601_s17   ;;  %s6870_s15 = smov %s5597_s16 }
 0x212   : > { %p11_p5 = scmp.ge.s32.totalorder %s14_s17, 4   ;;  %s6871_s16 = smov %s6873_s18 }
 0x214   :  { %13 = sbr.rel (!%p11_p5) target bundleno = 2 (0x2), region = 85 }

</bundles_post_ra>
